<compile_context>
chip_gen: v7x
topology: tpu7x:2x2x1
jax: 0.10.0
libtpu: 0.0.40
codegen_flags: <defaults>
</compile_context>

<pallas_src>
import functools

import numpy as np
import jax
import jax.numpy as jnp
from jax.experimental import pallas as pl
from jax.experimental.pallas import tpu as pltpu

EPS = 1e-5
LANES = 128          # every activation lane layout is zero-padded to one full vreg row


def _full_spec(shape):
    zeros = (0,) * len(shape)
    return pl.BlockSpec(shape, lambda i, _z=zeros: _z)


def _layer_dims(embedding_size, height, width):
    chans = [3, embedding_size, embedding_size // 2, embedding_size]
    dims, h, w = [], height, width
    for l in range(3):
        dims.append((h, w, chans[l], h - 2, w - 2, chans[l + 1]))
        h, w = h - 2, w - 2
    return dims


# -----------------------------------------------------------------------------
# Parameter init (PyTorch layouts) + host-side packing into kernel operands
# -----------------------------------------------------------------------------
def init_params(key, embedding_size):
    """Deterministic parameters in PyTorch layouts (Conv2d: (Co,Ci,3,3), Linear: (out,in))."""
    E = embedding_size
    conv_dims = [(3, E), (E, E // 2), (E // 2, E)]
    fc_dims = [(E, 2 * E), (2 * E, 2 * E), (2 * E, E + 1), (E + 1, E)]
    keys = jax.random.split(key, 2 * (len(conv_dims) + len(fc_dims)))
    ki = iter(range(len(keys)))
    conv_raw = []
    for cin, cout in conv_dims:
        w = 0.1 * jax.random.normal(keys[next(ki)], (cout, cin, 3, 3), jnp.float32)
        b = 0.1 * jax.random.normal(keys[next(ki)], (cout,), jnp.float32)
        conv_raw.append((w, b))
    fc_raw = []
    for fin, fout in fc_dims:
        w = 0.1 * jax.random.normal(keys[next(ki)], (fout, fin), jnp.float32)
        b = 0.1 * jax.random.normal(keys[next(ki)], (fout,), jnp.float32)
        fc_raw.append((w, b))
    return conv_raw, fc_raw


def prepare_params(conv_raw, fc_raw, batch, height, width, embedding_size):
    """Precompute (once, host-side) the handful of packed constants the fused kernel consumes."""
    B, H0, E = batch, height, embedding_size
    dims = _layer_dims(E, height, width)
    r_out0 = B * H0 - 2                                   # rows after the first conv

    # 0..8: block-Toeplitz conv matrices (3 per layer, one per kh row shift),
    # 9..11: per-channel gather (Wo*Co lanes -> Co channel columns), 12..14: its transpose.
    mats = np.zeros((15, LANES, LANES), np.float32)
    bn_rows = np.zeros((3, 8, LANES), np.float32)         # row 0: bias_t, 1: gamma, 2: beta
    masks = np.zeros((3, r_out0, LANES), np.float32)      # valid-row masks for BN statistics

    for l, ((wt, bs), (hi, wi, ci, ho, wo, co)) in enumerate(zip(conv_raw, dims)):
        wt = np.asarray(wt)                               # (Co, Ci, 3, 3)
        bs = np.asarray(bs)                               # (Co,)
        assert wi * ci <= LANES and wo * co <= LANES
        wk = np.transpose(wt, (2, 3, 1, 0))               # (kh, kw, Ci, Co)
        for kh in range(3):
            for kw in range(3):
                for x0 in range(wo):
                    r0, c0 = (x0 + kw) * ci, x0 * co
                    mats[3 * l + kh, r0:r0 + ci, c0:c0 + co] = wk[kh, kw]
        for x0 in range(wo):
            mats[9 + l, x0 * co:(x0 + 1) * co, 0:co] = np.eye(co, dtype=np.float32)
        mats[12 + l] = mats[9 + l].T
        bn_rows[l, 0, :wo * co] = np.tile(bs, wo)         # conv bias in (Wo, Co) lane layout
        bn_rows[l, 1, :co] = 1.0                          # BatchNorm2d gamma (default init)
        bn_rows[l, 2, :co] = 0.0                          # BatchNorm2d beta  (default init)
        for b in range(B):
            masks[l, b * H0:b * H0 + ho, :] = 1.0

    ho3, wo3, co3 = dims[-1][3], dims[-1][4], dims[-1][5]
    pool_s = np.zeros((B, B * H0 - 6), np.float32)        # AdaptiveAvgPool2d((1,1)) averager
    for b in range(B):
        pool_s[b, b * H0:b * H0 + ho3] = 1.0 / float(ho3 * wo3)

    # FC weights in (in, out) layout; layer-3 channel gather folded into fc1 host-side;
    # the awkward (E+1)-wide fc3<->fc4 hop is zero-padded (exact through ReLU + matmul).
    (w1, b1), (w2, b2), (w3, b3), (w4, b4) = [
        (np.asarray(w), np.asarray(b)) for (w, b) in fc_raw]
    pf = int(-(-max(2 * E, E + 1, 16) // 8) * 8)
    gath3 = mats[11, :, :co3]                             # (128, E)
    fcw1 = np.zeros((LANES, pf), np.float32)
    fcw1[:, :w1.shape[0]] = gath3 @ w1.T                  # pool-gather folded into fc1
    fc_rest = np.zeros((3 * pf + 8, pf), np.float32)
    fc_rest[0:w2.shape[1], 0:w2.shape[0]] = w2.T
    fc_rest[pf:pf + w3.shape[1], 0:w3.shape[0]] = w3.T
    fc_rest[2 * pf:2 * pf + w4.shape[1], 0:w4.shape[0]] = w4.T
    fc_rest[3 * pf + 0, 0:b1.shape[0]] = b1
    fc_rest[3 * pf + 1, 0:b2.shape[0]] = b2
    fc_rest[3 * pf + 2, 0:b3.shape[0]] = b3
    fc_rest[3 * pf + 3, 0:b4.shape[0]] = b4

    return tuple(jnp.asarray(a) for a in (mats, bn_rows, masks, pool_s, fcw1, fc_rest))


# -----------------------------------------------------------------------------
# Fused forward: one pallas_call, zero scratch, activations stay in registers
# -----------------------------------------------------------------------------
@functools.partial(jax.jit, static_argnames=("embedding_size",))
def convolutional_model_forward(x_nchw, params, *, embedding_size):
    mats, bn_rows, masks, pool_s, fcw1, fc_rest = params
    B, C0, H0, W0 = x_nchw.shape
    E = embedding_size
    dims = _layer_dims(E, H0, W0)
    R = B * H0
    PFW = fcw1.shape[1]

    # NCHW -> lane-dense (B*H, W*C) layout, zero-padded to 128 lanes (only XLA glue left).
    x2d = jnp.transpose(x_nchw, (0, 2, 3, 1)).reshape(R, W0 * C0).astype(jnp.float32)
    x2d = jnp.pad(x2d, ((0, 0), (0, LANES - W0 * C0)))

    def kernel(x_ref, mats_ref, bn_ref, mask_ref, pool_ref, fcw1_ref, fcr_ref, o_ref):
        act = x_ref[...]                                                 # (B*H0, 128)
        r_in = R
        for l, (hi, wi, ci, ho, wo, co) in enumerate(dims):
            r_out = r_in - 2
            # 3x3 conv == 3 adjacent accumulating MXU matmuls over the whole batch block
            # (one per kh row shift).  Rows straddling an image boundary are never consumed
            # by later valid rows and are masked out of the BN statistics below.
            z = jnp.dot(act[0:r_out, :], mats_ref[3 * l + 0],
                        preferred_element_type=jnp.float32)
            z = z + jnp.dot(act[1:r_out + 1, :], mats_ref[3 * l + 1],
                            preferred_element_type=jnp.float32)
            z = z + jnp.dot(act[2:r_out + 2, :], mats_ref[3 * l + 2],
                            preferred_element_type=jnp.float32)
            bnc = bn_ref[l]                                              # (8, 128)
            z = z + bnc[0:1, :]                                          # conv bias
            # Single-pass BatchNorm batch statistics (training mode, biased variance) over
            # valid rows only; [col_sum; col_sq] gathered per channel with ONE matmul.
            zm = z * mask_ref[l][0:r_out, :]
            col = jnp.concatenate(
                [jnp.sum(zm, axis=0, keepdims=True),
                 jnp.sum(zm * z, axis=0, keepdims=True)], axis=0)        # (2, 128)
            stats = jnp.dot(col, mats_ref[9 + l],
                            preferred_element_type=jnp.float32) * (1.0 / float(B * ho * wo))
            mean, ex2 = stats[0:1, :], stats[1:2, :]
            var = jnp.maximum(ex2 - mean * mean, 0.0)
            scale = bnc[1:2, :] * jax.lax.rsqrt(var + EPS)               # rsqrt on the EUP
            shift = bnc[2:3, :] - mean * scale
            tr = jnp.dot(jnp.concatenate([scale, shift], axis=0), mats_ref[12 + l],
                         preferred_element_type=jnp.float32)             # back to (Wo,Co) lanes
            act = jnp.maximum(z * tr[0:1, :] + tr[1:2, :], 0.0)          # fused BN + ReLU
            r_in = r_out

        # AdaptiveAvgPool2d((1,1)) + Flatten + fc1..fc4 (layer-3 gather folded into fc1).
        pooled = jnp.dot(pool_ref[...], act, preferred_element_type=jnp.float32)   # (B, 128)
        fcr = fcr_ref[...]
        h = jnp.maximum(jnp.dot(pooled, fcw1_ref[...], preferred_element_type=jnp.float32)
                        + fcr[3 * PFW + 0:3 * PFW + 1, :], 0.0)
        h = jnp.maximum(jnp.dot(h, fcr[0:PFW, :], preferred_element_type=jnp.float32)
                        + fcr[3 * PFW + 1:3 * PFW + 2, :], 0.0)
        h = jnp.maximum(jnp.dot(h, fcr[PFW:2 * PFW, :], preferred_element_type=jnp.float32)
                        + fcr[3 * PFW + 2:3 * PFW + 3, :], 0.0)
        out = jnp.dot(h, fcr[2 * PFW:3 * PFW, :], preferred_element_type=jnp.float32) \
            + fcr[3 * PFW + 3:3 * PFW + 4, :]
        o_ref[...] = out[:, 0:E]

    inputs = (x2d, mats, bn_rows, masks, pool_s, fcw1, fc_rest)
    return pl.pallas_call(
        kernel,
        grid=(1,),
        in_specs=[_full_spec(a.shape) for a in inputs],
        out_specs=_full_spec((B, E)),
        out_shape=jax.ShapeDtypeStruct((B, E), jnp.float32),
        compiler_params=pltpu.CompilerParams(dimension_semantics=("arbitrary",)),
    )(*inputs)


# -----------------------------------------------------------------------------
# Pure-JAX reference (mirrors the PyTorch module in train mode) for self-check
# -----------------------------------------------------------------------------
def reference_forward(x_nchw, conv_raw, fc_raw):
    x = jnp.transpose(x_nchw, (0, 2, 3, 1)).astype(jnp.float32)
    for (wt, bs) in conv_raw:
        wk = jnp.transpose(wt, (2, 3, 1, 0))              # (kh, kw, Ci, Co)
        Ho, Wo = x.shape[1] - 2, x.shape[2] - 2
        y = jnp.zeros((x.shape[0], Ho, Wo, wt.shape[0]), jnp.float32)
        for kh in range(3):
            for kw in range(3):
                y = y + jnp.einsum('bhwc,cd->bhwd',
                                   x[:, kh:kh + Ho, kw:kw + Wo, :], wk[kh, kw])
        y = y + bs
        mean = jnp.mean(y, axis=(0, 1, 2), keepdims=True)
        var = jnp.mean(jnp.square(y - mean), axis=(0, 1, 2), keepdims=True)
        x = jnp.maximum((y - mean) * jax.lax.rsqrt(var + EPS), 0.0)   # gamma=1, beta=0
    h = jnp.mean(x, axis=(1, 2))                          # AdaptiveAvgPool2d((1,1)) + Flatten
    for i, (wt, bs) in enumerate(fc_raw):
        h = h @ wt.T + bs
        if i < len(fc_raw) - 1:
            h = jnp.maximum(h, 0.0)
    return h


if __name__ == "__main__":
    E = 8            # embedding_size
    B, H, W = 2, 16, 16
    key = jax.random.PRNGKey(0)
    k_x, k_p = jax.random.split(key)

    x = jax.random.normal(k_x, (B, 3, H, W), jnp.float32)       # NCHW, as in PyTorch
    conv_raw, fc_raw = init_params(k_p, E)
    params = prepare_params(conv_raw, fc_raw, B, H, W, E)

    out = convolutional_model_forward(x, params, embedding_size=E)
    out = jax.block_until_ready(out)
    assert out.shape == (B, E), out.shape

    ref = jax.block_until_ready(reference_forward(x, conv_raw, fc_raw))
    np.testing.assert_allclose(np.asarray(out), np.asarray(ref), rtol=5e-3, atol=2e-4)
    print("KERNEL_OK")
</pallas_src>

<mosaic_0001>
module attributes {stable_mosaic.version = 11 : i64} {
  func.func @kernel(%arg0: i32, %arg1: memref<32x128xf32, #tpu.memory_space<vmem>>, %arg2: memref<15x128x128xf32, #tpu.memory_space<vmem>>, %arg3: memref<3x8x128xf32, #tpu.memory_space<vmem>>, %arg4: memref<3x30x128xf32, #tpu.memory_space<vmem>>, %arg5: memref<2x26xf32, #tpu.memory_space<vmem>>, %arg6: memref<128x16xf32, #tpu.memory_space<vmem>>, %arg7: memref<56x16xf32, #tpu.memory_space<vmem>>, %arg8: memref<2x8xf32, #tpu.memory_space<vmem>>) attributes {dimension_semantics = [#tpu.dimension_semantics<arbitrary>], iteration_bounds = array<i64: 1>, scalar_prefetch = 0 : i64, scratch_operands = 0 : i64, tpu.core_type = #tpu.core_type<tc>, window_params = [{pipeline_mode = #tpu.pipeline_mode<synchronous>, transform_indices = @transform_0, window_bounds = array<i64: 32, 128>}, {pipeline_mode = #tpu.pipeline_mode<synchronous>, transform_indices = @transform_1, window_bounds = array<i64: 15, 128, 128>}, {pipeline_mode = #tpu.pipeline_mode<synchronous>, transform_indices = @transform_2, window_bounds = array<i64: 3, 8, 128>}, {pipeline_mode = #tpu.pipeline_mode<synchronous>, transform_indices = @transform_3, window_bounds = array<i64: 3, 30, 128>}, {pipeline_mode = #tpu.pipeline_mode<synchronous>, transform_indices = @transform_4, window_bounds = array<i64: 2, 26>}, {pipeline_mode = #tpu.pipeline_mode<synchronous>, transform_indices = @transform_5, window_bounds = array<i64: 128, 16>}, {pipeline_mode = #tpu.pipeline_mode<synchronous>, transform_indices = @transform_6, window_bounds = array<i64: 56, 16>}, {pipeline_mode = #tpu.pipeline_mode<synchronous>, transform_indices = @transform_7, window_bounds = array<i64: 2, 8>}]} {
    %c0 = arith.constant 0 : index
    %c0_0 = arith.constant 0 : index
    %0 = vector.load %arg1[%c0, %c0_0] : memref<32x128xf32, #tpu.memory_space<vmem>>, vector<32x128xf32>
    %1 = vector.extract_strided_slice %0 {offsets = [0, 0], sizes = [30, 128], strides = [1, 1]} : vector<32x128xf32> to vector<30x128xf32>
    %c0_1 = arith.constant 0 : index
    %c0_2 = arith.constant 0 : index
    %c0_3 = arith.constant 0 : index
    %2 = vector.load %arg2[%c0_1, %c0_2, %c0_3] : memref<15x128x128xf32, #tpu.memory_space<vmem>>, vector<1x128x128xf32>
    %3 = vector.shape_cast %2 : vector<1x128x128xf32> to vector<128x128xf32>
    %cst = arith.constant dense<0.000000e+00> : vector<30x128xf32>
    %4 = tpu.matmul %1, %3, %cst {dimension_numbers = #tpu.dot_dimension_numbers<[1], [0], [0], [1], [0, 0, 1, 1], [], []>} : vector<30x128xf32>, vector<128x128xf32>, vector<30x128xf32> -> vector<30x128xf32>
    %5 = vector.extract_strided_slice %0 {offsets = [1, 0], sizes = [30, 128], strides = [1, 1]} : vector<32x128xf32> to vector<30x128xf32>
    %c1 = arith.constant 1 : index
    %c0_4 = arith.constant 0 : index
    %c0_5 = arith.constant 0 : index
    %6 = vector.load %arg2[%c1, %c0_4, %c0_5] : memref<15x128x128xf32, #tpu.memory_space<vmem>>, vector<1x128x128xf32>
    %7 = vector.shape_cast %6 : vector<1x128x128xf32> to vector<128x128xf32>
    %cst_6 = arith.constant dense<0.000000e+00> : vector<30x128xf32>
    %8 = tpu.matmul %5, %7, %cst_6 {dimension_numbers = #tpu.dot_dimension_numbers<[1], [0], [0], [1], [0, 0, 1, 1], [], []>} : vector<30x128xf32>, vector<128x128xf32>, vector<30x128xf32> -> vector<30x128xf32>
    %9 = arith.addf %4, %8 : vector<30x128xf32>
    %10 = vector.extract_strided_slice %0 {offsets = [2, 0], sizes = [30, 128], strides = [1, 1]} : vector<32x128xf32> to vector<30x128xf32>
    %c2 = arith.constant 2 : index
    %c0_7 = arith.constant 0 : index
    %c0_8 = arith.constant 0 : index
    %11 = vector.load %arg2[%c2, %c0_7, %c0_8] : memref<15x128x128xf32, #tpu.memory_space<vmem>>, vector<1x128x128xf32>
    %12 = vector.shape_cast %11 : vector<1x128x128xf32> to vector<128x128xf32>
    %cst_9 = arith.constant dense<0.000000e+00> : vector<30x128xf32>
    %13 = tpu.matmul %10, %12, %cst_9 {dimension_numbers = #tpu.dot_dimension_numbers<[1], [0], [0], [1], [0, 0, 1, 1], [], []>} : vector<30x128xf32>, vector<128x128xf32>, vector<30x128xf32> -> vector<30x128xf32>
    %14 = arith.addf %9, %13 : vector<30x128xf32>
    %c0_10 = arith.constant 0 : index
    %c0_11 = arith.constant 0 : index
    %c0_12 = arith.constant 0 : index
    %15 = vector.load %arg3[%c0_10, %c0_11, %c0_12] : memref<3x8x128xf32, #tpu.memory_space<vmem>>, vector<1x8x128xf32>
    %16 = vector.shape_cast %15 : vector<1x8x128xf32> to vector<8x128xf32>
    %17 = vector.extract_strided_slice %16 {offsets = [0, 0], sizes = [1, 128], strides = [1, 1]} : vector<8x128xf32> to vector<1x128xf32>
    %18 = vector.broadcast %17 : vector<1x128xf32> to vector<30x128xf32>
    %19 = arith.addf %14, %18 : vector<30x128xf32>
    %c0_13 = arith.constant 0 : index
    %c0_14 = arith.constant 0 : index
    %c0_15 = arith.constant 0 : index
    %20 = vector.load %arg4[%c0_13, %c0_14, %c0_15] : memref<3x30x128xf32, #tpu.memory_space<vmem>>, vector<1x30x128xf32>
    %21 = vector.shape_cast %20 : vector<1x30x128xf32> to vector<30x128xf32>
    %22 = arith.mulf %19, %21 : vector<30x128xf32>
    %cst_16 = arith.constant dense<0.000000e+00> : vector<128xf32>
    %23 = vector.multi_reduction <add>, %22, %cst_16 [0] : vector<30x128xf32> to vector<128xf32>
    %24 = vector.shape_cast %23 : vector<128xf32> to vector<1x128xf32>
    %25 = arith.mulf %22, %19 : vector<30x128xf32>
    %cst_17 = arith.constant dense<0.000000e+00> : vector<128xf32>
    %26 = vector.multi_reduction <add>, %25, %cst_17 [0] : vector<30x128xf32> to vector<128xf32>
    %27 = vector.shape_cast %26 : vector<128xf32> to vector<1x128xf32>
    %28 = tpu.concatenate %24, %27 in 0 : vector<1x128xf32>, vector<1x128xf32> -> vector<2x128xf32>
    %c9 = arith.constant 9 : index
    %c0_18 = arith.constant 0 : index
    %c0_19 = arith.constant 0 : index
    %29 = vector.load %arg2[%c9, %c0_18, %c0_19] : memref<15x128x128xf32, #tpu.memory_space<vmem>>, vector<1x128x128xf32>
    %30 = vector.shape_cast %29 : vector<1x128x128xf32> to vector<128x128xf32>
    %cst_20 = arith.constant dense<0.000000e+00> : vector<2x128xf32>
    %31 = tpu.matmul %28, %30, %cst_20 {dimension_numbers = #tpu.dot_dimension_numbers<[1], [0], [0], [1], [0, 0, 1, 1], [], []>} : vector<2x128xf32>, vector<128x128xf32>, vector<2x128xf32> -> vector<2x128xf32>
    %cst_21 = arith.constant 0.00255102036 : f32
    %32 = vector.broadcast %cst_21 : f32 to vector<2x128xf32>
    %33 = arith.mulf %31, %32 : vector<2x128xf32>
    %34 = vector.extract_strided_slice %33 {offsets = [0, 0], sizes = [1, 128], strides = [1, 1]} : vector<2x128xf32> to vector<1x128xf32>
    %35 = vector.extract_strided_slice %33 {offsets = [1, 0], sizes = [1, 128], strides = [1, 1]} : vector<2x128xf32> to vector<1x128xf32>
    %36 = arith.mulf %34, %34 : vector<1x128xf32>
    %37 = arith.subf %35, %36 : vector<1x128xf32>
    %cst_22 = arith.constant 0.000000e+00 : f32
    %38 = vector.broadcast %cst_22 : f32 to vector<1x128xf32>
    %39 = arith.maximumf %37, %38 : vector<1x128xf32>
    %40 = vector.extract_strided_slice %16 {offsets = [1, 0], sizes = [1, 128], strides = [1, 1]} : vector<8x128xf32> to vector<1x128xf32>
    %cst_23 = arith.constant 9.99999974E-6 : f32
    %41 = vector.broadcast %cst_23 : f32 to vector<1x128xf32>
    %42 = arith.addf %39, %41 : vector<1x128xf32>
    %43 = math.rsqrt %42 : vector<1x128xf32>
    %44 = arith.mulf %40, %43 : vector<1x128xf32>
    %45 = vector.extract_strided_slice %16 {offsets = [2, 0], sizes = [1, 128], strides = [1, 1]} : vector<8x128xf32> to vector<1x128xf32>
    %46 = arith.mulf %34, %44 : vector<1x128xf32>
    %47 = arith.subf %45, %46 : vector<1x128xf32>
    %48 = tpu.concatenate %44, %47 in 0 : vector<1x128xf32>, vector<1x128xf32> -> vector<2x128xf32>
    %c12 = arith.constant 12 : index
    %c0_24 = arith.constant 0 : index
    %c0_25 = arith.constant 0 : index
    %49 = vector.load %arg2[%c12, %c0_24, %c0_25] : memref<15x128x128xf32, #tpu.memory_space<vmem>>, vector<1x128x128xf32>
    %50 = vector.shape_cast %49 : vector<1x128x128xf32> to vector<128x128xf32>
    %cst_26 = arith.constant dense<0.000000e+00> : vector<2x128xf32>
    %51 = tpu.matmul %48, %50, %cst_26 {dimension_numbers = #tpu.dot_dimension_numbers<[1], [0], [0], [1], [0, 0, 1, 1], [], []>} : vector<2x128xf32>, vector<128x128xf32>, vector<2x128xf32> -> vector<2x128xf32>
    %52 = vector.extract_strided_slice %51 {offsets = [0, 0], sizes = [1, 128], strides = [1, 1]} : vector<2x128xf32> to vector<1x128xf32>
    %53 = vector.broadcast %52 : vector<1x128xf32> to vector<30x128xf32>
    %54 = arith.mulf %19, %53 : vector<30x128xf32>
    %55 = vector.extract_strided_slice %51 {offsets = [1, 0], sizes = [1, 128], strides = [1, 1]} : vector<2x128xf32> to vector<1x128xf32>
    %56 = vector.broadcast %55 : vector<1x128xf32> to vector<30x128xf32>
    %57 = arith.addf %54, %56 : vector<30x128xf32>
    %cst_27 = arith.constant 0.000000e+00 : f32
    %58 = vector.broadcast %cst_27 : f32 to vector<30x128xf32>
    %59 = arith.maximumf %57, %58 : vector<30x128xf32>
    %60 = vector.extract_strided_slice %59 {offsets = [0, 0], sizes = [28, 128], strides = [1, 1]} : vector<30x128xf32> to vector<28x128xf32>
    %c3 = arith.constant 3 : index
    %c0_28 = arith.constant 0 : index
    %c0_29 = arith.constant 0 : index
    %61 = vector.load %arg2[%c3, %c0_28, %c0_29] : memref<15x128x128xf32, #tpu.memory_space<vmem>>, vector<1x128x128xf32>
    %62 = vector.shape_cast %61 : vector<1x128x128xf32> to vector<128x128xf32>
    %cst_30 = arith.constant dense<0.000000e+00> : vector<28x128xf32>
    %63 = tpu.matmul %60, %62, %cst_30 {dimension_numbers = #tpu.dot_dimension_numbers<[1], [0], [0], [1], [0, 0, 1, 1], [], []>} : vector<28x128xf32>, vector<128x128xf32>, vector<28x128xf32> -> vector<28x128xf32>
    %64 = vector.extract_strided_slice %59 {offsets = [1, 0], sizes = [28, 128], strides = [1, 1]} : vector<30x128xf32> to vector<28x128xf32>
    %c4 = arith.constant 4 : index
    %c0_31 = arith.constant 0 : index
    %c0_32 = arith.constant 0 : index
    %65 = vector.load %arg2[%c4, %c0_31, %c0_32] : memref<15x128x128xf32, #tpu.memory_space<vmem>>, vector<1x128x128xf32>
    %66 = vector.shape_cast %65 : vector<1x128x128xf32> to vector<128x128xf32>
    %cst_33 = arith.constant dense<0.000000e+00> : vector<28x128xf32>
    %67 = tpu.matmul %64, %66, %cst_33 {dimension_numbers = #tpu.dot_dimension_numbers<[1], [0], [0], [1], [0, 0, 1, 1], [], []>} : vector<28x128xf32>, vector<128x128xf32>, vector<28x128xf32> -> vector<28x128xf32>
    %68 = arith.addf %63, %67 : vector<28x128xf32>
    %69 = vector.extract_strided_slice %59 {offsets = [2, 0], sizes = [28, 128], strides = [1, 1]} : vector<30x128xf32> to vector<28x128xf32>
    %c5 = arith.constant 5 : index
    %c0_34 = arith.constant 0 : index
    %c0_35 = arith.constant 0 : index
    %70 = vector.load %arg2[%c5, %c0_34, %c0_35] : memref<15x128x128xf32, #tpu.memory_space<vmem>>, vector<1x128x128xf32>
    %71 = vector.shape_cast %70 : vector<1x128x128xf32> to vector<128x128xf32>
    %cst_36 = arith.constant dense<0.000000e+00> : vector<28x128xf32>
    %72 = tpu.matmul %69, %71, %cst_36 {dimension_numbers = #tpu.dot_dimension_numbers<[1], [0], [0], [1], [0, 0, 1, 1], [], []>} : vector<28x128xf32>, vector<128x128xf32>, vector<28x128xf32> -> vector<28x128xf32>
    %73 = arith.addf %68, %72 : vector<28x128xf32>
    %c1_37 = arith.constant 1 : index
    %c0_38 = arith.constant 0 : index
    %c0_39 = arith.constant 0 : index
    %74 = vector.load %arg3[%c1_37, %c0_38, %c0_39] : memref<3x8x128xf32, #tpu.memory_space<vmem>>, vector<1x8x128xf32>
    %75 = vector.shape_cast %74 : vector<1x8x128xf32> to vector<8x128xf32>
    %76 = vector.extract_strided_slice %75 {offsets = [0, 0], sizes = [1, 128], strides = [1, 1]} : vector<8x128xf32> to vector<1x128xf32>
    %77 = vector.broadcast %76 : vector<1x128xf32> to vector<28x128xf32>
    %78 = arith.addf %73, %77 : vector<28x128xf32>
    %c1_40 = arith.constant 1 : index
    %c0_41 = arith.constant 0 : index
    %c0_42 = arith.constant 0 : index
    %79 = vector.load %arg4[%c1_40, %c0_41, %c0_42] : memref<3x30x128xf32, #tpu.memory_space<vmem>>, vector<1x30x128xf32>
    %80 = vector.shape_cast %79 : vector<1x30x128xf32> to vector<30x128xf32>
    %81 = vector.extract_strided_slice %80 {offsets = [0, 0], sizes = [28, 128], strides = [1, 1]} : vector<30x128xf32> to vector<28x128xf32>
    %82 = arith.mulf %78, %81 : vector<28x128xf32>
    %cst_43 = arith.constant dense<0.000000e+00> : vector<128xf32>
    %83 = vector.multi_reduction <add>, %82, %cst_43 [0] : vector<28x128xf32> to vector<128xf32>
    %84 = vector.shape_cast %83 : vector<128xf32> to vector<1x128xf32>
    %85 = arith.mulf %82, %78 : vector<28x128xf32>
    %cst_44 = arith.constant dense<0.000000e+00> : vector<128xf32>
    %86 = vector.multi_reduction <add>, %85, %cst_44 [0] : vector<28x128xf32> to vector<128xf32>
    %87 = vector.shape_cast %86 : vector<128xf32> to vector<1x128xf32>
    %88 = tpu.concatenate %84, %87 in 0 : vector<1x128xf32>, vector<1x128xf32> -> vector<2x128xf32>
    %c10 = arith.constant 10 : index
    %c0_45 = arith.constant 0 : index
    %c0_46 = arith.constant 0 : index
    %89 = vector.load %arg2[%c10, %c0_45, %c0_46] : memref<15x128x128xf32, #tpu.memory_space<vmem>>, vector<1x128x128xf32>
    %90 = vector.shape_cast %89 : vector<1x128x128xf32> to vector<128x128xf32>
    %cst_47 = arith.constant dense<0.000000e+00> : vector<2x128xf32>
    %91 = tpu.matmul %88, %90, %cst_47 {dimension_numbers = #tpu.dot_dimension_numbers<[1], [0], [0], [1], [0, 0, 1, 1], [], []>} : vector<2x128xf32>, vector<128x128xf32>, vector<2x128xf32> -> vector<2x128xf32>
    %cst_48 = arith.constant 0.00347222225 : f32
    %92 = vector.broadcast %cst_48 : f32 to vector<2x128xf32>
    %93 = arith.mulf %91, %92 : vector<2x128xf32>
    %94 = vector.extract_strided_slice %93 {offsets = [0, 0], sizes = [1, 128], strides = [1, 1]} : vector<2x128xf32> to vector<1x128xf32>
    %95 = vector.extract_strided_slice %93 {offsets = [1, 0], sizes = [1, 128], strides = [1, 1]} : vector<2x128xf32> to vector<1x128xf32>
    %96 = arith.mulf %94, %94 : vector<1x128xf32>
    %97 = arith.subf %95, %96 : vector<1x128xf32>
    %cst_49 = arith.constant 0.000000e+00 : f32
    %98 = vector.broadcast %cst_49 : f32 to vector<1x128xf32>
    %99 = arith.maximumf %97, %98 : vector<1x128xf32>
    %100 = vector.extract_strided_slice %75 {offsets = [1, 0], sizes = [1, 128], strides = [1, 1]} : vector<8x128xf32> to vector<1x128xf32>
    %cst_50 = arith.constant 9.99999974E-6 : f32
    %101 = vector.broadcast %cst_50 : f32 to vector<1x128xf32>
    %102 = arith.addf %99, %101 : vector<1x128xf32>
    %103 = math.rsqrt %102 : vector<1x128xf32>
    %104 = arith.mulf %100, %103 : vector<1x128xf32>
    %105 = vector.extract_strided_slice %75 {offsets = [2, 0], sizes = [1, 128], strides = [1, 1]} : vector<8x128xf32> to vector<1x128xf32>
    %106 = arith.mulf %94, %104 : vector<1x128xf32>
    %107 = arith.subf %105, %106 : vector<1x128xf32>
    %108 = tpu.concatenate %104, %107 in 0 : vector<1x128xf32>, vector<1x128xf32> -> vector<2x128xf32>
    %c13 = arith.constant 13 : index
    %c0_51 = arith.constant 0 : index
    %c0_52 = arith.constant 0 : index
    %109 = vector.load %arg2[%c13, %c0_51, %c0_52] : memref<15x128x128xf32, #tpu.memory_space<vmem>>, vector<1x128x128xf32>
    %110 = vector.shape_cast %109 : vector<1x128x128xf32> to vector<128x128xf32>
    %cst_53 = arith.constant dense<0.000000e+00> : vector<2x128xf32>
    %111 = tpu.matmul %108, %110, %cst_53 {dimension_numbers = #tpu.dot_dimension_numbers<[1], [0], [0], [1], [0, 0, 1, 1], [], []>} : vector<2x128xf32>, vector<128x128xf32>, vector<2x128xf32> -> vector<2x128xf32>
    %112 = vector.extract_strided_slice %111 {offsets = [0, 0], sizes = [1, 128], strides = [1, 1]} : vector<2x128xf32> to vector<1x128xf32>
    %113 = vector.broadcast %112 : vector<1x128xf32> to vector<28x128xf32>
    %114 = arith.mulf %78, %113 : vector<28x128xf32>
    %115 = vector.extract_strided_slice %111 {offsets = [1, 0], sizes = [1, 128], strides = [1, 1]} : vector<2x128xf32> to vector<1x128xf32>
    %116 = vector.broadcast %115 : vector<1x128xf32> to vector<28x128xf32>
    %117 = arith.addf %114, %116 : vector<28x128xf32>
    %cst_54 = arith.constant 0.000000e+00 : f32
    %118 = vector.broadcast %cst_54 : f32 to vector<28x128xf32>
    %119 = arith.maximumf %117, %118 : vector<28x128xf32>
    %120 = vector.extract_strided_slice %119 {offsets = [0, 0], sizes = [26, 128], strides = [1, 1]} : vector<28x128xf32> to vector<26x128xf32>
    %c6 = arith.constant 6 : index
    %c0_55 = arith.constant 0 : index
    %c0_56 = arith.constant 0 : index
    %121 = vector.load %arg2[%c6, %c0_55, %c0_56] : memref<15x128x128xf32, #tpu.memory_space<vmem>>, vector<1x128x128xf32>
    %122 = vector.shape_cast %121 : vector<1x128x128xf32> to vector<128x128xf32>
    %cst_57 = arith.constant dense<0.000000e+00> : vector<26x128xf32>
    %123 = tpu.matmul %120, %122, %cst_57 {dimension_numbers = #tpu.dot_dimension_numbers<[1], [0], [0], [1], [0, 0, 1, 1], [], []>} : vector<26x128xf32>, vector<128x128xf32>, vector<26x128xf32> -> vector<26x128xf32>
    %124 = vector.extract_strided_slice %119 {offsets = [1, 0], sizes = [26, 128], strides = [1, 1]} : vector<28x128xf32> to vector<26x128xf32>
    %c7 = arith.constant 7 : index
    %c0_58 = arith.constant 0 : index
    %c0_59 = arith.constant 0 : index
    %125 = vector.load %arg2[%c7, %c0_58, %c0_59] : memref<15x128x128xf32, #tpu.memory_space<vmem>>, vector<1x128x128xf32>
    %126 = vector.shape_cast %125 : vector<1x128x128xf32> to vector<128x128xf32>
    %cst_60 = arith.constant dense<0.000000e+00> : vector<26x128xf32>
    %127 = tpu.matmul %124, %126, %cst_60 {dimension_numbers = #tpu.dot_dimension_numbers<[1], [0], [0], [1], [0, 0, 1, 1], [], []>} : vector<26x128xf32>, vector<128x128xf32>, vector<26x128xf32> -> vector<26x128xf32>
    %128 = arith.addf %123, %127 : vector<26x128xf32>
    %129 = vector.extract_strided_slice %119 {offsets = [2, 0], sizes = [26, 128], strides = [1, 1]} : vector<28x128xf32> to vector<26x128xf32>
    %c8 = arith.constant 8 : index
    %c0_61 = arith.constant 0 : index
    %c0_62 = arith.constant 0 : index
    %130 = vector.load %arg2[%c8, %c0_61, %c0_62] : memref<15x128x128xf32, #tpu.memory_space<vmem>>, vector<1x128x128xf32>
    %131 = vector.shape_cast %130 : vector<1x128x128xf32> to vector<128x128xf32>
    %cst_63 = arith.constant dense<0.000000e+00> : vector<26x128xf32>
    %132 = tpu.matmul %129, %131, %cst_63 {dimension_numbers = #tpu.dot_dimension_numbers<[1], [0], [0], [1], [0, 0, 1, 1], [], []>} : vector<26x128xf32>, vector<128x128xf32>, vector<26x128xf32> -> vector<26x128xf32>
    %133 = arith.addf %128, %132 : vector<26x128xf32>
    %c2_64 = arith.constant 2 : index
    %c0_65 = arith.constant 0 : index
    %c0_66 = arith.constant 0 : index
    %134 = vector.load %arg3[%c2_64, %c0_65, %c0_66] : memref<3x8x128xf32, #tpu.memory_space<vmem>>, vector<1x8x128xf32>
    %135 = vector.shape_cast %134 : vector<1x8x128xf32> to vector<8x128xf32>
    %136 = vector.extract_strided_slice %135 {offsets = [0, 0], sizes = [1, 128], strides = [1, 1]} : vector<8x128xf32> to vector<1x128xf32>
    %137 = vector.broadcast %136 : vector<1x128xf32> to vector<26x128xf32>
    %138 = arith.addf %133, %137 : vector<26x128xf32>
    %c2_67 = arith.constant 2 : index
    %c0_68 = arith.constant 0 : index
    %c0_69 = arith.constant 0 : index
    %139 = vector.load %arg4[%c2_67, %c0_68, %c0_69] : memref<3x30x128xf32, #tpu.memory_space<vmem>>, vector<1x30x128xf32>
    %140 = vector.shape_cast %139 : vector<1x30x128xf32> to vector<30x128xf32>
    %141 = vector.extract_strided_slice %140 {offsets = [0, 0], sizes = [26, 128], strides = [1, 1]} : vector<30x128xf32> to vector<26x128xf32>
    %142 = arith.mulf %138, %141 : vector<26x128xf32>
    %cst_70 = arith.constant dense<0.000000e+00> : vector<128xf32>
    %143 = vector.multi_reduction <add>, %142, %cst_70 [0] : vector<26x128xf32> to vector<128xf32>
    %144 = vector.shape_cast %143 : vector<128xf32> to vector<1x128xf32>
    %145 = arith.mulf %142, %138 : vector<26x128xf32>
    %cst_71 = arith.constant dense<0.000000e+00> : vector<128xf32>
    %146 = vector.multi_reduction <add>, %145, %cst_71 [0] : vector<26x128xf32> to vector<128xf32>
    %147 = vector.shape_cast %146 : vector<128xf32> to vector<1x128xf32>
    %148 = tpu.concatenate %144, %147 in 0 : vector<1x128xf32>, vector<1x128xf32> -> vector<2x128xf32>
    %c11 = arith.constant 11 : index
    %c0_72 = arith.constant 0 : index
    %c0_73 = arith.constant 0 : index
    %149 = vector.load %arg2[%c11, %c0_72, %c0_73] : memref<15x128x128xf32, #tpu.memory_space<vmem>>, vector<1x128x128xf32>
    %150 = vector.shape_cast %149 : vector<1x128x128xf32> to vector<128x128xf32>
    %cst_74 = arith.constant dense<0.000000e+00> : vector<2x128xf32>
    %151 = tpu.matmul %148, %150, %cst_74 {dimension_numbers = #tpu.dot_dimension_numbers<[1], [0], [0], [1], [0, 0, 1, 1], [], []>} : vector<2x128xf32>, vector<128x128xf32>, vector<2x128xf32> -> vector<2x128xf32>
    %cst_75 = arith.constant 5.000000e-03 : f32
    %152 = vector.broadcast %cst_75 : f32 to vector<2x128xf32>
    %153 = arith.mulf %151, %152 : vector<2x128xf32>
    %154 = vector.extract_strided_slice %153 {offsets = [0, 0], sizes = [1, 128], strides = [1, 1]} : vector<2x128xf32> to vector<1x128xf32>
    %155 = vector.extract_strided_slice %153 {offsets = [1, 0], sizes = [1, 128], strides = [1, 1]} : vector<2x128xf32> to vector<1x128xf32>
    %156 = arith.mulf %154, %154 : vector<1x128xf32>
    %157 = arith.subf %155, %156 : vector<1x128xf32>
    %cst_76 = arith.constant 0.000000e+00 : f32
    %158 = vector.broadcast %cst_76 : f32 to vector<1x128xf32>
    %159 = arith.maximumf %157, %158 : vector<1x128xf32>
    %160 = vector.extract_strided_slice %135 {offsets = [1, 0], sizes = [1, 128], strides = [1, 1]} : vector<8x128xf32> to vector<1x128xf32>
    %cst_77 = arith.constant 9.99999974E-6 : f32
    %161 = vector.broadcast %cst_77 : f32 to vector<1x128xf32>
    %162 = arith.addf %159, %161 : vector<1x128xf32>
    %163 = math.rsqrt %162 : vector<1x128xf32>
    %164 = arith.mulf %160, %163 : vector<1x128xf32>
    %165 = vector.extract_strided_slice %135 {offsets = [2, 0], sizes = [1, 128], strides = [1, 1]} : vector<8x128xf32> to vector<1x128xf32>
    %166 = arith.mulf %154, %164 : vector<1x128xf32>
    %167 = arith.subf %165, %166 : vector<1x128xf32>
    %168 = tpu.concatenate %164, %167 in 0 : vector<1x128xf32>, vector<1x128xf32> -> vector<2x128xf32>
    %c14 = arith.constant 14 : index
    %c0_78 = arith.constant 0 : index
    %c0_79 = arith.constant 0 : index
    %169 = vector.load %arg2[%c14, %c0_78, %c0_79] : memref<15x128x128xf32, #tpu.memory_space<vmem>>, vector<1x128x128xf32>
    %170 = vector.shape_cast %169 : vector<1x128x128xf32> to vector<128x128xf32>
    %cst_80 = arith.constant dense<0.000000e+00> : vector<2x128xf32>
    %171 = tpu.matmul %168, %170, %cst_80 {dimension_numbers = #tpu.dot_dimension_numbers<[1], [0], [0], [1], [0, 0, 1, 1], [], []>} : vector<2x128xf32>, vector<128x128xf32>, vector<2x128xf32> -> vector<2x128xf32>
    %172 = vector.extract_strided_slice %171 {offsets = [0, 0], sizes = [1, 128], strides = [1, 1]} : vector<2x128xf32> to vector<1x128xf32>
    %173 = vector.broadcast %172 : vector<1x128xf32> to vector<26x128xf32>
    %174 = arith.mulf %138, %173 : vector<26x128xf32>
    %175 = vector.extract_strided_slice %171 {offsets = [1, 0], sizes = [1, 128], strides = [1, 1]} : vector<2x128xf32> to vector<1x128xf32>
    %176 = vector.broadcast %175 : vector<1x128xf32> to vector<26x128xf32>
    %177 = arith.addf %174, %176 : vector<26x128xf32>
    %cst_81 = arith.constant 0.000000e+00 : f32
    %178 = vector.broadcast %cst_81 : f32 to vector<26x128xf32>
    %179 = arith.maximumf %177, %178 : vector<26x128xf32>
    %c0_82 = arith.constant 0 : index
    %c0_83 = arith.constant 0 : index
    %180 = vector.load %arg5[%c0_82, %c0_83] : memref<2x26xf32, #tpu.memory_space<vmem>>, vector<2x26xf32>
    %cst_84 = arith.constant dense<0.000000e+00> : vector<2x128xf32>
    %181 = tpu.matmul %180, %179, %cst_84 {dimension_numbers = #tpu.dot_dimension_numbers<[1], [0], [0], [1], [0, 0, 1, 1], [], []>} : vector<2x26xf32>, vector<26x128xf32>, vector<2x128xf32> -> vector<2x128xf32>
    %c0_85 = arith.constant 0 : index
    %c0_86 = arith.constant 0 : index
    %182 = vector.load %arg7[%c0_85, %c0_86] : memref<56x16xf32, #tpu.memory_space<vmem>>, vector<56x16xf32>
    %c0_87 = arith.constant 0 : index
    %c0_88 = arith.constant 0 : index
    %183 = vector.load %arg6[%c0_87, %c0_88] : memref<128x16xf32, #tpu.memory_space<vmem>>, vector<128x16xf32>
    %cst_89 = arith.constant dense<0.000000e+00> : vector<2x16xf32>
    %184 = tpu.matmul %181, %183, %cst_89 {dimension_numbers = #tpu.dot_dimension_numbers<[1], [0], [0], [1], [0, 0, 1, 1], [], []>} : vector<2x128xf32>, vector<128x16xf32>, vector<2x16xf32> -> vector<2x16xf32>
    %185 = vector.extract_strided_slice %182 {offsets = [48, 0], sizes = [1, 16], strides = [1, 1]} : vector<56x16xf32> to vector<1x16xf32>
    %186 = vector.broadcast %185 : vector<1x16xf32> to vector<2x16xf32>
    %187 = arith.addf %184, %186 : vector<2x16xf32>
    %cst_90 = arith.constant 0.000000e+00 : f32
    %188 = vector.broadcast %cst_90 : f32 to vector<2x16xf32>
    %189 = arith.maximumf %187, %188 : vector<2x16xf32>
    %190 = vector.extract_strided_slice %182 {offsets = [0, 0], sizes = [16, 16], strides = [1, 1]} : vector<56x16xf32> to vector<16x16xf32>
    %cst_91 = arith.constant dense<0.000000e+00> : vector<2x16xf32>
    %191 = tpu.matmul %189, %190, %cst_91 {dimension_numbers = #tpu.dot_dimension_numbers<[1], [0], [0], [1], [0, 0, 1, 1], [], []>} : vector<2x16xf32>, vector<16x16xf32>, vector<2x16xf32> -> vector<2x16xf32>
    %192 = vector.extract_strided_slice %182 {offsets = [49, 0], sizes = [1, 16], strides = [1, 1]} : vector<56x16xf32> to vector<1x16xf32>
    %193 = vector.broadcast %192 : vector<1x16xf32> to vector<2x16xf32>
    %194 = arith.addf %191, %193 : vector<2x16xf32>
    %cst_92 = arith.constant 0.000000e+00 : f32
    %195 = vector.broadcast %cst_92 : f32 to vector<2x16xf32>
    %196 = arith.maximumf %194, %195 : vector<2x16xf32>
    %197 = vector.extract_strided_slice %182 {offsets = [16, 0], sizes = [16, 16], strides = [1, 1]} : vector<56x16xf32> to vector<16x16xf32>
    %cst_93 = arith.constant dense<0.000000e+00> : vector<2x16xf32>
    %198 = tpu.matmul %196, %197, %cst_93 {dimension_numbers = #tpu.dot_dimension_numbers<[1], [0], [0], [1], [0, 0, 1, 1], [], []>} : vector<2x16xf32>, vector<16x16xf32>, vector<2x16xf32> -> vector<2x16xf32>
    %199 = vector.extract_strided_slice %182 {offsets = [50, 0], sizes = [1, 16], strides = [1, 1]} : vector<56x16xf32> to vector<1x16xf32>
    %200 = vector.broadcast %199 : vector<1x16xf32> to vector<2x16xf32>
    %201 = arith.addf %198, %200 : vector<2x16xf32>
    %cst_94 = arith.constant 0.000000e+00 : f32
    %202 = vector.broadcast %cst_94 : f32 to vector<2x16xf32>
    %203 = arith.maximumf %201, %202 : vector<2x16xf32>
    %204 = vector.extract_strided_slice %182 {offsets = [32, 0], sizes = [16, 16], strides = [1, 1]} : vector<56x16xf32> to vector<16x16xf32>
    %cst_95 = arith.constant dense<0.000000e+00> : vector<2x16xf32>
    %205 = tpu.matmul %203, %204, %cst_95 {dimension_numbers = #tpu.dot_dimension_numbers<[1], [0], [0], [1], [0, 0, 1, 1], [], []>} : vector<2x16xf32>, vector<16x16xf32>, vector<2x16xf32> -> vector<2x16xf32>
    %206 = vector.extract_strided_slice %182 {offsets = [51, 0], sizes = [1, 16], strides = [1, 1]} : vector<56x16xf32> to vector<1x16xf32>
    %207 = vector.broadcast %206 : vector<1x16xf32> to vector<2x16xf32>
    %208 = arith.addf %205, %207 : vector<2x16xf32>
    %209 = vector.extract_strided_slice %208 {offsets = [0, 0], sizes = [2, 8], strides = [1, 1]} : vector<2x16xf32> to vector<2x8xf32>
    %c0_96 = arith.constant 0 : index
    %c0_97 = arith.constant 0 : index
    %210 = vector.load %arg8[%c0_96, %c0_97] : memref<2x8xf32, #tpu.memory_space<vmem>>, vector<2x8xf32>
    tpu.vector_store %arg8[%c0_96, %c0_97], %209 {strides = array<i32>} : memref<2x8xf32, #tpu.memory_space<vmem>>, vector<2x8xf32>,
    return
  }
  func.func @transform_0(%arg0: i32) -> (i32, i32) {
    %c0_i32 = arith.constant 0 : i32
    %c0_i32_0 = arith.constant 0 : i32
    %c0_i32_1 = arith.constant 0 : i32
    return %c0_i32, %c0_i32_0 : i32, i32
  }
  func.func @transform_1(%arg0: i32) -> (i32, i32, i32) {
    %c0_i32 = arith.constant 0 : i32
    %c0_i32_0 = arith.constant 0 : i32
    %c0_i32_1 = arith.constant 0 : i32
    %c0_i32_2 = arith.constant 0 : i32
    return %c0_i32, %c0_i32_0, %c0_i32_1 : i32, i32, i32
  }
  func.func @transform_2(%arg0: i32) -> (i32, i32, i32) {
    %c0_i32 = arith.constant 0 : i32
    %c0_i32_0 = arith.constant 0 : i32
    %c0_i32_1 = arith.constant 0 : i32
    %c0_i32_2 = arith.constant 0 : i32
    return %c0_i32, %c0_i32_0, %c0_i32_1 : i32, i32, i32
  }
  func.func @transform_3(%arg0: i32) -> (i32, i32, i32) {
    %c0_i32 = arith.constant 0 : i32
    %c0_i32_0 = arith.constant 0 : i32
    %c0_i32_1 = arith.constant 0 : i32
    %c0_i32_2 = arith.constant 0 : i32
    return %c0_i32, %c0_i32_0, %c0_i32_1 : i32, i32, i32
  }
  func.func @transform_4(%arg0: i32) -> (i32, i32) {
    %c0_i32 = arith.constant 0 : i32
    %c0_i32_0 = arith.constant 0 : i32
    %c0_i32_1 = arith.constant 0 : i32
    return %c0_i32, %c0_i32_0 : i32, i32
  }
  func.func @transform_5(%arg0: i32) -> (i32, i32) {
    %c0_i32 = arith.constant 0 : i32
    %c0_i32_0 = arith.constant 0 : i32
    %c0_i32_1 = arith.constant 0 : i32
    return %c0_i32, %c0_i32_0 : i32, i32
  }
  func.func @transform_6(%arg0: i32) -> (i32, i32) {
    %c0_i32 = arith.constant 0 : i32
    %c0_i32_0 = arith.constant 0 : i32
    %c0_i32_1 = arith.constant 0 : i32
    return %c0_i32, %c0_i32_0 : i32, i32
  }
  func.func @transform_7(%arg0: i32) -> (i32, i32) {
    %c0_i32 = arith.constant 0 : i32
    %c0_i32_0 = arith.constant 0 : i32
    %c0_i32_1 = arith.constant 0 : i32
    return %c0_i32, %c0_i32_0 : i32, i32
  }
}

</mosaic_0001>

<bundles_post_ra>
// kernel: convolutional_model_forward.1
= control target key start
LH: loop header
LB: loop body
LE: loop exit
PB: predicated region body
PF: predicated region fallthrough
CT: control target
= control target key end

     0   :  { %12 = vsyncpa [#allocation3], 0  ;;  %s4278_s0 = inlined_call_operand.vmem [shape: f32[32,128], index: 0, kind: input, shape index: {}]   ;;  %s4279_s1 = inlined_call_operand.hbm [shape: f32[15,128,128], index: 1, kind: input, shape index: {}]   ;;  %s4280_s2 = inlined_call_operand.vmem [shape: f32[3,8,128], index: 2, kind: input, shape index: {}]   ;;  %s4281_s3 = inlined_call_operand.vmem [shape: f32[3,30,128], index: 3, kind: input, shape index: {}]   ;;  %s4282_s4 = inlined_call_operand.vmem [shape: f32[2,26], index: 4, kind: input, shape index: {}]   ;;  %s4283_s5 = inlined_call_operand.vmem [shape: f32[128,16], index: 5, kind: input, shape index: {}]   ;;  %s4284_s6 = inlined_call_operand.vmem [shape: f32[56,16], index: 6, kind: input, shape index: {}]   ;;  %s4285_s7 = inlined_call_operand.hbm [shape: f32[2,8], index: 7, kind: output, shape index: {}]  }
   0x1   :  { %13 = vsyncpa [#allocation4], 0  ;;  %s3767_s24 = smov [#allocation2]   ;;  %s3719_s28 = scalar_lea.hbm %s4279_s1, 30720 }
   0x2   :  { %s21_s25 = sshll.u32 %s3767_s24, 4  ;;  %p3720_p0 = scmp.ne.s32.totalorder %s4279_s1, %s3719_s28  ;;  %s22_s25 = int_to_ptr.vmem [resolvable:$true] %s21_s25 }
   0x3   :  { %p3723_p1 = scmp.lt.u32.totalorder %s3719_s28, %s4279_s1 }
   0x5   :  { %p3725_p2 = pnand %p3723_p1, %p3720_p0 }
   0x7   :  { %3728 = shalt.err (!%p3725_p2)
}
   0x8   :  { %s3729_s10 = scalar_lea.vmem %s22_s25, 30720  ;;  %p3734_p4 = scmp.lt.s32.totalorder %s22_s25, %s22_s25 }
   0x9   :  { %p3730_p3 = scmp.ne.s32.totalorder %s22_s25, %s3729_s10  ;;  %p3735_p5 = scmp.lt.s32.totalorder %s3729_s10, %s3729_s10 }
   0xb   :  { %p3736_p6 = por %p3735_p5, %p3734_p4 }
   0xd   :  { %p3737_p7 = pnand %p3736_p6, %p3730_p3 }
   0xf   :  { %3740 = shalt.err (!%p3737_p7)
}
  0x10   :  { %s3768_s11 = smov 128   ;;  %s3769_s12 = smov 8  }
  0x11   :  { %27 = dma.hbm_to_vmem [thread:$0]  %s4279_s1, 30720, %s22_s25, [#allocation3], %s3768_s11, %s3768_s11, %s3769_s12  }
  0x12   :  { %3763 = dma.done.wait [#allocation3], 30720  }
  0x13   :  { %3764 = vsyncadd [#allocation3], 4294936576  ;;  %v3770_v0 = vmov 0.0|0.0   ;;  %v62_v1 = vld [vmem:[#allocation2 + $0x80] sm:$0xff]  ;;  %v63_v2 = vld [vmem:[#allocation2 + $0x88] sm:$0xff]  ;;  %vm82_vm0 = vcmask 1046528  }
  0x14   :  { %3305 = vmatprep.subr.bf16.mxu1 %v3770_v0  ;;  %v64_v3 = vld [vmem:[#allocation2 + $0x90] sm:$0xff]  ;;  %v3209_v4 = vpack.c.bf16 %v63_v2, %v62_v1  ;;  %v65_v5 = vld [vmem:[#allocation2 + $0x98] sm:$0xff]  ;;  %v66_v7 = vld [vmem:[#allocation2 + $0xa0] sm:$0xff]  ;;  %vm281_vm1 = vcmask 1045504   ;;  %vm3771_vm2 = vmmov 0   ;;  %vm423_vm3 = vcmask 1040384  }
  0x15   :  { %v3213_v6 = vpack.c.bf16 %v65_v5, %v64_v3  ;;  %v67_v8 = vld [vmem:[#allocation2 + $0xa8] sm:$0xff]  ;;  %v3831_v10 = vld [vmem:[%s4278_s0] sm:$0xff]  ;;  %v68_v12 = vld [vmem:[#allocation2 + $0xb0] sm:$0xff]  ;;  %vm998_vm4 = vcmask 1043456   ;;  %vm1595_vm5 = vcmask 1041408   ;;  %vm3773_vm6 = vmmov 1  }
  0x16   :  { %3210 = vmatprep.subr.bf16.mxu0 %v3209_v4  ;;  %v3217_v9 = vpack.c.bf16 %v67_v8, %v66_v7  ;;  %v3836_v11 = vld [vmem:[%s4278_s0 + $0x8] sm:$0xff]  ;;  %v69_v13 = vld [vmem:[#allocation2 + $0xb8] sm:$0xff]  ;;  %v83_v14 = vrot.slane %v3831_v10, 1  ;;  %v70_v18 = vld [vmem:[#allocation2 + $0xc0] sm:$0xff]  ;;  %vm1836_vm8 = vcmask 211968   ;;  %vm2015_vm9 = vcmask 130048  }
  0x17   :  { %3212 = vmatpush3.bf16.msra.mxu0 %v3209_v4  ;;  %v84_v15 = vrot.slane %v3836_v11, 1  ;;  %v3221_v17 = vpack.c.bf16 %v69_v13, %v68_v12  ;;  %v71_v19 = vld [vmem:[#allocation2 + $0xc8] sm:$0xff]  ;;  %v3844_v20 = vld [vmem:[%s4278_s0 + $0x10] sm:$0xff]  ;;  %v3849_v21 = vld [vmem:[%s4278_s0 + $0x18] sm:$0xff]  ;;  %v283_v12 = vrot.slane %v3836_v11, 2  ;;  %s3774_s18 = smov [#allocation5]  }
  0x18   :  { %3214 = vmatprep.subr.bf16.mxu0 %v3213_v6  ;;  %v285_v22 = vrot.slane %v3844_v20, 2  ;;  %v287_v23 = vrot.slane %v3849_v21, 2  ;;  %v3225_v24 = vpack.c.bf16 %v71_v19, %v70_v18  ;;  %v72_v25 = vld [vmem:[#allocation2 + $0xd0] sm:$0xff]  ;;  %v73_v26 = vld [vmem:[#allocation2 + $0xd8] sm:$0xff]  ;;  %v426_v29 = vld [vmem:[#allocation2 + $0x480] sm:$0xff]  ;;  %v86_v40 = vrot.slane %v3844_v20, 1 }
  0x19   :  { %v85_v16 = vsel %vm82_vm0, %v83_v14, %v84_v15  ;;  %v3229_v28 = vpack.c.bf16 %v73_v26, %v72_v25  ;;  %v427_v30 = vld [vmem:[#allocation2 + $0x488] sm:$0xff]  ;;  %v74_v31 = vld [vmem:[#allocation2 + $0xe0] sm:$0xff]  ;;  %v76_v35 = vld [vmem:[#allocation2 + $0xf0] sm:$0xff]  ;;  %v88_v42 = vrot.slane %v3849_v21, 1  ;;  %s2253_s19 = sshll.u32 %s3774_s18, 4  ;;  %vm2245_vm10 = vcmask 58368   ;;  %s2254_s19 = int_to_ptr.vmem [resolvable:$true] %s2253_s19 }
  0x1a   :  { %2622 = vmatprep.mubr.f32.mxu0 %v85_v16  ;;  %v3858_v27 = vsel %vm281_vm1, %v285_v22, %v287_v23  ;;  %v75_v32 = vld [vmem:[#allocation2 + $0xe8] sm:$0xff]  ;;  %v3306_v33 = vpack.c.bf16 %v427_v30, %v426_v29  ;;  %v77_v36 = vld [vmem:[#allocation2 + $0xf8] sm:$0xff]  ;;  %v45_v38 = vld [vmem:[#allocation2] sm:$0xff]  ;;  %v87_v45 = vsel %vm82_vm0, %v84_v15, %v86_v40  ;;  %p3746_p9 = scmp.lt.s32.totalorder %s2254_s19, %s2254_s19 }
  0x1b   :  { %3216 = vmatpush3.bf16.msra.mxu0 %v3213_v6  ;;  %v3233_v34 = vpack.c.bf16 %v75_v32, %v74_v31  ;;  %v3237_v37 = vpack.c.bf16 %v77_v36, %v76_v35  ;;  %v46_v39 = vld [vmem:[#allocation2 + $0x8] sm:$0xff]  ;;  %v47_v43 = vld [vmem:[#allocation2 + $0x10] sm:$0xff]  ;;  %v48_v44 = vld [vmem:[#allocation2 + $0x18] sm:$0xff]  ;;  %v89_v47 = vsel %vm82_vm0, %v86_v40, %v88_v42  ;;  %v286_v35 = vsel %vm281_vm1, %v283_v12, %v285_v22 }
  0x1c   :  { %3218 = vmatprep.subr.bf16.mxu0 %v3217_v9  ;;  %3307 = vmatpush3.bf16.msra.mxu1 %v3306_v33  ;;  %v3241_v41 = vpack.c.bf16 %v46_v39, %v45_v38  ;;  %v3245_v46 = vpack.c.bf16 %v48_v44, %v47_v43  ;;  %v49_v48 = vld [vmem:[#allocation2 + $0x20] sm:$0xff]  ;;  %v50_v49 = vld [vmem:[#allocation2 + $0x28] sm:$0xff]  ;;  %v51_v51 = vld [vmem:[#allocation2 + $0x30] sm:$0xff] }
  0x1d   :  { %3308 = vmatprep.subr.bf16.mxu1 %v3770_v0  ;;  %v3249_v50 = vpack.c.bf16 %v50_v49, %v49_v48  ;;  %v52_v52 = vld [vmem:[#allocation2 + $0x38] sm:$0xff]  ;;  %v53_v54 = vld [vmem:[#allocation2 + $0x40] sm:$0xff]  ;;  %v54_v55 = vld [vmem:[#allocation2 + $0x48] sm:$0xff]  ;;  %v3772_v48 = vmov 0.0  }
  0x1e   :  { %v3253_v53 = vpack.c.bf16 %v52_v52, %v51_v51  ;;  %v3257_v56 = vpack.c.bf16 %v54_v55, %v53_v54  ;;  %v55_v57 = vld [vmem:[#allocation2 + $0x50] sm:$0xff]  ;;  %v56_v58 = vld [vmem:[#allocation2 + $0x58] sm:$0xff]  ;;  %v57_v60 = vld [vmem:[#allocation2 + $0x60] sm:$0xff]  ;;  %2736 = vmatprep.mubr.msk.f32.mxu1 %vm3771_vm2, %v3772_v48 }
  0x1f   :  { %3220 = vmatpush3.bf16.msra.mxu0 %v3217_v9  ;;  %v3261_v59 = vpack.c.bf16 %v56_v58, %v55_v57  ;;  %v58_v61 = vld [vmem:[#allocation2 + $0x68] sm:$0xff]  ;;  %v59_v63 = vld [vmem:[#allocation2 + $0x70] sm:$0xff]  ;;  %v60_v1 = vld [vmem:[#allocation2 + $0x78] sm:$0xff]  ;;  %v282_v9 = vrot.slane %v3831_v10, 2 }
  0x20   :  { %3222 = vmatprep.subr.bf16.mxu0 %v3221_v17  ;;  %v3265_v62 = vpack.c.bf16 %v58_v61, %v57_v60  ;;  %v3269_v2 = vpack.c.bf16 %v60_v1, %v59_v63  ;;  %v265_v3 = vld [vmem:[#allocation2 + $0x100] sm:$0xff]  ;;  %v266_v4 = vld [vmem:[#allocation2 + $0x108] sm:$0xff]  ;;  %v267_v6 = vld [vmem:[#allocation2 + $0x110] sm:$0xff] }
  0x21   :  { %v3273_v5 = vpack.c.bf16 %v266_v4, %v265_v3  ;;  %v268_v7 = vld [vmem:[#allocation2 + $0x118] sm:$0xff]  ;;  %v269_v13 = vld [vmem:[#allocation2 + $0x120] sm:$0xff]  ;;  %v270_v14 = vld [vmem:[#allocation2 + $0x128] sm:$0xff]  ;;  %v284_v16 = vsel %vm281_vm1, %v282_v9, %v283_v12 }
  0x22   :  { %v3277_v8 = vpack.c.bf16 %v268_v7, %v267_v6  ;;  %v3281_v15 = vpack.c.bf16 %v270_v14, %v269_v13  ;;  %v272_v18 = vld [vmem:[#allocation2 + $0x138] sm:$0xff]  ;;  %v273_v19 = vld [vmem:[#allocation2 + $0x140] sm:$0xff]  ;;  %v275_v25 = vld [vmem:[#allocation2 + $0x150] sm:$0xff] }
  0x23   :  { %3224 = vmatpush3.bf16.msra.mxu0 %v3221_v17  ;;  %v271_v17 = vld [vmem:[#allocation2 + $0x130] sm:$0xff]  ;;  %v276_v26 = vld [vmem:[#allocation2 + $0x158] sm:$0xff]  ;;  %v277_v29 = vld [vmem:[#allocation2 + $0x160] sm:$0xff] }
  0x24   :  { %3226 = vmatprep.subr.bf16.mxu0 %v3225_v24  ;;  %v278_v30 = vld [vmem:[#allocation2 + $0x168] sm:$0xff]  ;;  %v279_v32 = vld [vmem:[#allocation2 + $0x170] sm:$0xff]  ;;  %v280_v33 = vld [vmem:[#allocation2 + $0x178] sm:$0xff] }
  0x25   :  { %v3297_v31 = vpack.c.bf16 %v278_v30, %v277_v29  ;;  %v428_v36 = vld [vmem:[#allocation2 + $0x490] sm:$0xff]  ;;  %v430_v39 = vld [vmem:[#allocation2 + $0x4a0] sm:$0xff]  ;;  %v431_v40 = vld [vmem:[#allocation2 + $0x4a8] sm:$0xff] }
  0x26   :  { %v433_v22 = vld [vmem:[#allocation2 + $0x4b8] sm:$0xff]  ;;  %v436_v43 = vld [vmem:[#allocation2 + $0x4d0] sm:$0xff]  ;;  %vm3646_vm7 = vmpackc.low %vm1595_vm5, %vm3773_vm6 }
  0x27   :  { %3228 = vmatpush3.bf16.msra.mxu0 %v3225_v24  ;;  %v274_v24 = vld [vmem:[#allocation2 + $0x148] sm:$0xff]  ;;  %v437_v44 = vld [vmem:[#allocation2 + $0x4d8] sm:$0xff]  ;;  %v393_v7 = vld [vmem:[%s4281_s3 + $0x10] sm:$0xff] }
  0x28   :  { %3230 = vmatprep.subr.bf16.mxu0 %v3229_v28  ;;  %v441_v51 = vld [vmem:[#allocation2 + $0x4f8] sm:$0xff] }
  0x29   :  { %v394_v4 = vld [vmem:[%s4281_s3 + $0x18] sm:$0x3f] }
  0x2b   :  { %3232 = vmatpush3.bf16.msra.mxu0 %v3229_v28  ;;  %v3293_v28 = vpack.c.bf16 %v276_v26, %v275_v25 }
  0x2c   :  { %3234 = vmatprep.subr.bf16.mxu0 %v3233_v34 }
  0x2f   :  { %3236 = vmatpush3.bf16.msra.mxu0 %v3233_v34  ;;  %v3301_v34 = vpack.c.bf16 %v280_v33, %v279_v32 }
  0x30   :  { %3238 = vmatprep.subr.bf16.mxu0 %v3237_v37 }
  0x33   :  { %3240 = vmatpush3.bf16.msra.mxu0 %v3237_v37  ;;  %v429_v37 = vld [vmem:[#allocation2 + $0x498] sm:$0xff] }
  0x34   :  { %3242 = vmatprep.subr.bf16.mxu0 %v3241_v41  ;;  %v3309_v38 = vpack.c.bf16 %v429_v37, %v428_v36 }
  0x36   :  { %2623 = vmatmul.mubr.f32.vlgmr.msra.gmra.mrb[0].mxu0 %v87_v45  ;;  %3310 = vmatpush3.bf16.msra.mxu1 %v3309_v38  ;;  %v3321_v45 = vpack.c.bf16 %v437_v44, %v436_v43  ;;  %v540_v43 = vld [vmem:[#allocation2 + $0x628] sm:$0xff] }
  0x37   :  { %3244 = vmatpush3.bf16.msra.mxu0 %v3241_v41  ;;  %2625 = vmatprep.mubr.f32.mxu0 %v89_v47  ;;  %v3312_v41 = vpack.c.bf16 %v431_v40, %v430_v39  ;;  %v439_v47 = vld [vmem:[#allocation2 + $0x4e8] sm:$0xff] }
  0x38   :  { %3246 = vmatprep.subr.bf16.mxu0 %v3245_v46  ;;  %3311 = vmatprep.subr.bf16.mxu1 %v3770_v0 }
  0x3a   :  { %2626 = vmatmul.mubr.f32.gmra.mrb[2].mxu0 %v88_v42  ;;  %3313 = vmatpush3.bf16.msra.mxu1 %v3312_v41  ;;  %v535_v41 = vld [vmem:[#allocation2 + $0x600] sm:$0xff] }
  0x3b   :  { %3248 = vmatpush3.bf16.msra.mxu0 %v3245_v46  ;;  %2660 = vmatprep.mubr.f32.mxu0 %v3831_v10  ;;  %v3285_v10 = vpack.c.bf16 %v272_v18, %v271_v17  ;;  %v438_v46 = vld [vmem:[#allocation2 + $0x4e0] sm:$0xff] }
  0x3c   :  { %3250 = vmatprep.subr.bf16.mxu0 %v3249_v50  ;;  %3314 = vmatprep.subr.bf16.mxu1 %v3770_v0  ;;  %v3324_v49 = vpack.c.bf16 %v439_v47, %v438_v46  ;;  %v542_v46 = vld [vmem:[#allocation2 + $0x638] sm:$0xff] }
  0x3f   :  { %3252 = vmatpush3.bf16.msra.mxu0 %v3249_v50  ;;  %v440_v50 = vld [vmem:[#allocation2 + $0x4f0] sm:$0xff] }
  0x40   :  { %3254 = vmatprep.subr.bf16.mxu0 %v3253_v53  ;;  %v3327_v52 = vpack.c.bf16 %v441_v51, %v440_v50  ;;  %v544_v50 = vld [vmem:[#allocation2 + $0x648] sm:$0xff] }
  0x43   :  { %3256 = vmatpush3.bf16.msra.mxu0 %v3253_v53  ;;  %v383_v53 = vlaneseq }
  0x44   :  { %3258 = vmatprep.subr.bf16.mxu0 %v3257_v56 }
  0x45   :  { %v3890_v54 = vshrl.u32 %v383_v53, 7  ;;  %v546_v53 = vld [vmem:[#allocation2 + $0x658] sm:$0xff] }
  0x47   :  { %3260 = vmatpush3.bf16.msra.mxu0 %v3257_v56  ;;  %v3893_v55 = vsub.s32 0, %v3890_v54  ;;  %v3898_v56 = vld [vmem:[%s4280_s2] sm:$0xff] }
  0x48   :  { %3262 = vmatprep.subr.bf16.mxu0 %v3261_v59 }
  0x49   :  { %v386_v57 = vrot.slane %v3898_v56, %v3893_v55 }
  0x4b   :  { %3264 = vmatpush3.bf16.msra.mxu0 %v3261_v59  ;;  %v392_v59 = vld [vmem:[%s4281_s3 + $0x8] sm:$0xff] }
  0x4c   :  { %3266 = vmatprep.subr.bf16.mxu0 %v3265_v62 }
  0x4f   :  { %3268 = vmatpush3.bf16.msra.mxu0 %v3265_v62  ;;  %v391_v62 = vld [vmem:[%s4281_s3] sm:$0xff] }
  0x50   :  { %3270 = vmatprep.subr.bf16.mxu0 %v3269_v2 }
  0x53   :  { %3272 = vmatpush3.bf16.msra.mxu0 %v3269_v2 }
  0x54   :  { %3274 = vmatprep.subr.bf16.mxu0 %v3273_v5 }
  0x56   :  { %2661 = vmatmul.mubr.f32.vlgmr.msra.gmra.mrb[0].mxu0 %v3836_v11  ;;  %v3289_v11 = vpack.c.bf16 %v274_v24, %v273_v19 }
  0x57   :  { %3276 = vmatpush3.bf16.msra.mxu0 %v3273_v5  ;;  %2663 = vmatprep.mubr.f32.mxu0 %v3844_v20  ;;  %v432_v20 = vld [vmem:[#allocation2 + $0x4b0] sm:$0xff] }
  0x58   :  { %3278 = vmatprep.subr.bf16.mxu0 %v3277_v8  ;;  %v3315_v42 = vpack.c.bf16 %v433_v22, %v432_v20  ;;  %v536_v20 = vld [vmem:[#allocation2 + $0x608] sm:$0xff] }
  0x59   :  { %v3330_v22 = vpack.c.bf16 %v536_v20, %v535_v41  ;;  %v670_v41 = vld [vmem:[#allocation2 + $0x258] sm:$0xff] }
  0x5a   :  { %2664 = vmatmul.mubr.f32.gmra.mrb[2].mxu0 %v3849_v21  ;;  %3316 = vmatpush3.bf16.msra.mxu1 %v3315_v42  ;;  %v434_v21 = vld [vmem:[#allocation2 + $0x4c0] sm:$0xff]  ;;  %v537_v42 = vld [vmem:[#allocation2 + $0x610] sm:$0xff] }
  0x5b   :  { %3280 = vmatpush3.bf16.msra.mxu0 %v3277_v8  ;;  %2698 = vmatprep.mubr.f32.mxu0 %v284_v16 }
  0x5c   :  { %3282 = vmatprep.subr.bf16.mxu0 %v3281_v15  ;;  %3317 = vmatprep.subr.bf16.mxu1 %v3770_v0 }
  0x5f   :  { %3284 = vmatpush3.bf16.msra.mxu0 %v3281_v15 }
  0x60   :  { %3286 = vmatprep.subr.bf16.mxu0 %v3285_v10 }
  0x63   :  { %3288 = vmatpush3.bf16.msra.mxu0 %v3285_v10 }
  0x64   :  { %3290 = vmatprep.subr.bf16.mxu0 %v3289_v11 }
  0x67   :  { %3292 = vmatpush3.bf16.msra.mxu0 %v3289_v11 }
  0x68   :  { %3294 = vmatprep.subr.bf16.mxu0 %v3293_v28 }
  0x6b   :  { %3296 = vmatpush3.bf16.msra.mxu0 %v3293_v28 }
  0x6c   :  { %3298 = vmatprep.subr.bf16.mxu0 %v3297_v31 }
  0x6f   :  { %3300 = vmatpush3.bf16.msra.mxu0 %v3297_v31 }
  0x70   :  { %3302 = vmatprep.subr.bf16.mxu0 %v3301_v34 }
  0x73   :  { %3304 = vmatpush3.bf16.msra.mxu0 %v3301_v34 }
  0x74   :  { %3449 = vmatprep.subr.bf16.mxu0 %v3770_v0 }
  0x76   :  { %2699 = vmatmul.mubr.f32.vlgmr.msra.gmra.mrb[0].mxu0 %v286_v35 }
  0x77   :  { %2701 = vmatprep.mubr.f32.mxu0 %v3858_v27 }
  0x7a   :  { %2702 = vmatmul.mubr.f32.gmra.mrb[2].mxu0 %v287_v23  ;;  %v435_v23 = vld [vmem:[#allocation2 + $0x4c8] sm:$0xff] }
  0x7b   :  { %v3318_v27 = vpack.c.bf16 %v435_v23, %v434_v21  ;;  %2920 = vmatprep.mubr.msk.f32.mxu0 %vm3771_vm2, %v3772_v48  ;;  %v538_v21 = vld [vmem:[#allocation2 + $0x618] sm:$0xff] }
  0x7c   :  { %v3333_v23 = vpack.c.bf16 %v538_v21, %v537_v42  ;;  %v672_v42 = vld [vmem:[#allocation2 + $0x268] sm:$0xff] }
  0x7d   :  { %3319 = vmatpush3.bf16.msra.mxu1 %v3318_v27  ;;  %v539_v27 = vld [vmem:[#allocation2 + $0x620] sm:$0xff] }
  0x7e   :  { %3320 = vmatprep.subr.bf16.mxu1 %v3770_v0  ;;  %v3336_v44 = vpack.c.bf16 %v540_v43, %v539_v27  ;;  %v674_v27 = vld [vmem:[#allocation2 + $0x278] sm:$0xff] }
  0x81   :  { %3322 = vmatpush3.bf16.msra.mxu1 %v3321_v45  ;;  %v541_v45 = vld [vmem:[#allocation2 + $0x630] sm:$0xff] }
  0x82   :  { %3323 = vmatprep.subr.bf16.mxu1 %v3770_v0  ;;  %v3339_v47 = vpack.c.bf16 %v542_v46, %v541_v45  ;;  %v643_v45 = vld [vmem:[#allocation2 + $0x188] sm:$0xff] }
  0x85   :  { %3325 = vmatpush3.bf16.msra.mxu1 %v3324_v49  ;;  %v543_v49 = vld [vmem:[#allocation2 + $0x640] sm:$0xff] }
  0x86   :  { %3326 = vmatprep.subr.bf16.mxu1 %v3770_v0  ;;  %v3342_v51 = vpack.c.bf16 %v544_v50, %v543_v49  ;;  %v1024_v49 = vld [vmem:[#allocation2 + $0x508] sm:$0xff] }
  0x89   :  { %3328 = vmatpush3.bf16.msra.mxu1 %v3327_v52  ;;  %v545_v52 = vld [vmem:[#allocation2 + $0x650] sm:$0xff] }
  0x8a   :  { %3329 = vmatprep.subr.bf16.mxu1 %v3770_v0 }
 0x149   :  { %v2700_v58 = vpop.f32.mrb[0].mxu0 }
 0x14a   :  { %v3905_v60 = vadd.f32 %v2700_v58, %v386_v57  ;;  %v359_v61 = vpop.f32.mrb[1].mxu0  ;;  %v547_v58 = vld [vmem:[#allocation2 + $0x660] sm:$0xff] }
 0x14b   :  { %v3910_v63 = vadd.f32 %v386_v57, %v359_v61 }
 0x14c   :  { %v396_v1 = vmul.f32 %v392_v59, %v3905_v60  ;;  %v548_v59 = vld [vmem:[#allocation2 + $0x668] sm:$0xff] }
 0x14d   :  { %v395_v2 = vmul.f32 %v391_v62, %v3910_v63  ;;  %v2703_v3 = vpop.f32.mrb[2].mxu0  ;;  %v3348_v61 = vpack.c.bf16 %v548_v59, %v547_v58  ;;  %v549_v62 = vld [vmem:[#allocation2 + $0x670] sm:$0xff] }
 0x14e   :  { %v3917_v5 = vadd.f32 %v2703_v3, %v386_v57  ;;  %v369_v6 = vpop.f32.mrb[3].mxu0  ;;  %v410_v8 = vmul.f32 %v396_v1, %v3905_v60  ;;  %v659_v3 = vld [vmem:[#allocation2 + $0x200] sm:$0xff] }
 0x14f   :  { %v409_v9 = vmul.f32 %v395_v2, %v3910_v63  ;;  %v3924_v12 = vadd.f32 %v386_v57, %v369_v6  ;;  %v399_v14 = vadd.f32 %v396_v1, %v395_v2  ;;  %v3345_v57 = vpack.c.bf16 %v546_v53, %v545_v52  ;;  %v550_v1 = vld [vmem:[#allocation2 + $0x678] sm:$0xff] }
 0x150   :  { %v398_v13 = vmul.f32 %v394_v4, %v3917_v5  ;;  %v3351_v2 = vpack.c.bf16 %v550_v1, %v549_v62  ;;  %v660_v4 = vld [vmem:[#allocation2 + $0x208] sm:$0xff] }
 0x151   :  { %v397_v15 = vmul.f32 %v393_v7, %v3924_v12  ;;  %v413_v17 = vadd.f32 %v410_v8, %v409_v9  ;;  %v3353_v6 = vpack.c.bf16 %v660_v4, %v659_v3 }
 0x152   :  { %v412_v16 = vmul.f32 %v398_v13, %v3917_v5  ;;  %v401_v19 = vsel %vm281_vm1, %v398_v13, 0.0 }
 0x153   :  { %v400_v18 = vadd.f32 %v399_v14, %v397_v15  ;;  %v411_v10 = vmul.f32 %v397_v15, %v3924_v12 }
 0x154   :  { %v415_v25 = vsel %vm281_vm1, %v412_v16, 0.0 }
 0x155   :  { %v402_v24 = vadd.f32 %v401_v19, %v400_v18  ;;  %v414_v11 = vadd.f32 %v413_v17, %v411_v10 }
 0x157   :  { %v403_v26 = vrot.slane %v402_v24, 4  ;;  %v416_v28 = vadd.f32 %v415_v25, %v414_v11 }
 0x159   :  { %v417_v29 = vrot.slane %v416_v28, 4  ;;  %v404_v30 = vadd.f32 %v403_v26, %v402_v24  ;;  %v661_v26 = vld [vmem:[#allocation2 + $0x210] sm:$0xff] }
 0x15b   :  { %v405_v31 = vrot.slane %v404_v30, 2  ;;  %v418_v32 = vadd.f32 %v417_v29, %v416_v28  ;;  %v662_v28 = vld [vmem:[#allocation2 + $0x218] sm:$0xff] }
 0x15d   :  { %v406_v33 = vadd.f32 %v405_v31, %v404_v30  ;;  %v419_v34 = vrot.slane %v418_v32, 2  ;;  %v3357_v30 = vpack.c.bf16 %v662_v28, %v661_v26 }
 0x15f   :  { %v407_v35 = vrot.slane %v406_v33, 1  ;;  %v420_v36 = vadd.f32 %v419_v34, %v418_v32  ;;  %v663_v32 = vld [vmem:[#allocation2 + $0x220] sm:$0xff] }
 0x161   :  { %v421_v37 = vrot.slane %v420_v36, 1  ;;  %v408_v38 = vadd.f32 %v407_v35, %v406_v33  ;;  %v664_v33 = vld [vmem:[#allocation2 + $0x228] sm:$0xff]  ;;  %v665_v35 = vld [vmem:[#allocation2 + $0x230] sm:$0xff] }
 0x162   :  { %v3361_v34 = vpack.c.bf16 %v664_v33, %v663_v32  ;;  %v649_v32 = vld [vmem:[#allocation2 + $0x1b8] sm:$0xff] }
 0x163   :  { %v422_v39 = vadd.f32 %v421_v37, %v420_v36  ;;  %v666_v36 = vld [vmem:[#allocation2 + $0x238] sm:$0xff] }
 0x164   :  { %v3365_v37 = vpack.c.bf16 %v666_v36, %v665_v35  ;;  %v651_v35 = vld [vmem:[#allocation2 + $0x1c8] sm:$0xff] }
 0x165   :  { %v424_v40 = vsel %vm423_vm3, %v408_v38, %v422_v39  ;;  %v667_v38 = vld [vmem:[#allocation2 + $0x240] sm:$0xff]  ;;  %v668_v39 = vld [vmem:[#allocation2 + $0x248] sm:$0xff] }
 0x166   :  { %2737 = vmatmul.mubr.f32.vlgmr.msra.gmra.mrb[0].mxu1 %v424_v40  ;;  %v669_v40 = vld [vmem:[#allocation2 + $0x250] sm:$0xff] }
 0x167   :  { %2771 = vmatprep.mubr.msk.f32.mxu1 %vm3771_vm2, %v3772_v48  ;;  %3331 = vmatpush3.bf16.msra.mxu1 %v3330_v22  ;;  %v3373_v20 = vpack.c.bf16 %v670_v41, %v669_v40  ;;  %v671_v22 = vld [vmem:[#allocation2 + $0x260] sm:$0xff]  ;;  %v655_v40 = vld [vmem:[#allocation2 + $0x1e8] sm:$0xff] }
 0x168   :  { %3332 = vmatprep.subr.bf16.mxu1 %v3770_v0  ;;  %v3377_v21 = vpack.c.bf16 %v672_v42, %v671_v22  ;;  %v657_v22 = vld [vmem:[#allocation2 + $0x1f8] sm:$0xff] }
 0x16b   :  { %3334 = vmatpush3.bf16.msra.mxu1 %v3333_v23  ;;  %v673_v23 = vld [vmem:[#allocation2 + $0x270] sm:$0xff] }
 0x16c   :  { %3335 = vmatprep.subr.bf16.mxu1 %v3770_v0  ;;  %v3381_v43 = vpack.c.bf16 %v674_v27, %v673_v23  ;;  %v862_v23 = vld [vmem:[#allocation2 + $0x288] sm:$0xff] }
 0x16f   :  { %3337 = vmatpush3.bf16.msra.mxu1 %v3336_v44  ;;  %v642_v44 = vld [vmem:[#allocation2 + $0x180] sm:$0xff] }
 0x170   :  { %3338 = vmatprep.subr.bf16.mxu1 %v3770_v0  ;;  %v3385_v46 = vpack.c.bf16 %v643_v45, %v642_v44  ;;  %v864_v44 = vld [vmem:[#allocation2 + $0x298] sm:$0xff] }
 0x173   :  { %3340 = vmatpush3.bf16.msra.mxu1 %v3339_v47  ;;  %v1023_v47 = vld [vmem:[#allocation2 + $0x500] sm:$0xff] }
 0x174   :  { %3341 = vmatprep.subr.bf16.mxu1 %v3770_v0  ;;  %v3450_v50 = vpack.c.bf16 %v1024_v49, %v1023_v47  ;;  %v866_v47 = vld [vmem:[#allocation2 + $0x2a8] sm:$0xff] }
 0x176   :  { %3451 = vmatpush3.bf16.msra.mxu0 %v3450_v50 }
 0x177   :  { %3343 = vmatpush3.bf16.msra.mxu1 %v3342_v51  ;;  %3452 = vmatprep.subr.bf16.mxu0 %v3770_v0  ;;  %v3947_v51 = vsub.s32 1, %v3890_v54 }
 0x178   :  { %3344 = vmatprep.subr.bf16.mxu1 %v3770_v0 }
 0x17b   :  { %3346 = vmatpush3.bf16.msra.mxu1 %v3345_v57 }
 0x17c   :  { %3347 = vmatprep.subr.bf16.mxu1 %v3770_v0 }
 0x17f   :  { %3349 = vmatpush3.bf16.msra.mxu1 %v3348_v61 }
 0x180   :  { %3350 = vmatprep.subr.bf16.mxu1 %v3770_v0 }
 0x183   :  { %3352 = vmatpush3.bf16.msra.mxu1 %v3351_v2 }
 0x184   :  { %3354 = vmatprep.subr.bf16.mxu1 %v3353_v6 }
 0x239   :  { %v508_v7 = vpop.f32.mrb[0].mxu1 }
 0x23a   :  { %v512_v8 = vmul.f32 0.0025510204, %v508_v7  ;;  %v2738_v9 = vpop.f32.mrb[1].mxu1 }
 0x23c   :  { %v513_v13 = vmul.f32 %v512_v8, %v512_v8 }
 0x23e   :  { %v515_v14 = vrot.slane %v513_v13, 7 }
 0x240   :  { %v517_v15 = vsub.f32 %v512_v8, %v515_v14  ;;  %v644_v14 = vld [vmem:[#allocation2 + $0x190] sm:$0xff] }
 0x242   :  { %v518_v16 = vmax.f32 %v517_v15, 0.0 }
 0x244   :  { %v519_v17 = vadd.f32 1e-05, %v518_v16 }
 0x246   :  { %3713 = vrsqrt.f32 %v519_v17 }
 0x250   :  { %v3714_v18 = vpop.eup %3713 }
 0x251   :  { %v521_v10 = vmul.f32 %v3714_v18, %v3898_v56 }
 0x253   :  { %v523_v19 = vrot.slane %v521_v10, 1 }
 0x255   :  { %v525_v24 = vmul.f32 %v523_v19, %v512_v8 }
 0x257   :  { %v527_v11 = vrot.slane %v525_v24, 6 }
 0x259   :  { %v529_v25 = vsub.f32 %v3898_v56, %v527_v11  ;;  %v3369_v56 = vpack.c.bf16 %v668_v39, %v667_v38  ;;  %v646_v11 = vld [vmem:[#allocation2 + $0x1a0] sm:$0xff]  ;;  %v653_v38 = vld [vmem:[#allocation2 + $0x1d8] sm:$0xff] }
 0x25b   :  { %v531_v29 = vrot.slane %v529_v25, 1  ;;  %v647_v25 = vld [vmem:[#allocation2 + $0x1a8] sm:$0xff] }
 0x25d   :  { %v533_v31 = vsel %vm423_vm3, %v523_v19, %v531_v29 }
 0x25e   :  { %2772 = vmatmul.mubr.f32.vlgmr.msra.gmra.mrb[2].mxu1 %v533_v31  ;;  %v648_v31 = vld [vmem:[#allocation2 + $0x1b0] sm:$0xff] }
 0x25f   :  { %3356 = vmatpush3.bf16.msra.mxu1 %v3353_v6  ;;  %v3397_v33 = vpack.c.bf16 %v649_v32, %v648_v31  ;;  %v1037_v31 = vld [vmem:[#allocation2 + $0x570] sm:$0xff]  ;;  %v1038_v32 = vld [vmem:[#allocation2 + $0x578] sm:$0xff] }
 0x260   :  { %3358 = vmatprep.subr.bf16.mxu1 %v3357_v30 }
 0x263   :  { %3360 = vmatpush3.bf16.msra.mxu1 %v3357_v30  ;;  %v3393_v30 = vpack.c.bf16 %v647_v25, %v646_v11  ;;  %v1033_v11 = vld [vmem:[#allocation2 + $0x550] sm:$0xff]  ;;  %v1034_v25 = vld [vmem:[#allocation2 + $0x558] sm:$0xff] }
 0x264   :  { %3362 = vmatprep.subr.bf16.mxu1 %v3361_v34 }
 0x267   :  { %3364 = vmatpush3.bf16.msra.mxu1 %v3361_v34  ;;  %v650_v34 = vld [vmem:[#allocation2 + $0x1c0] sm:$0xff] }
 0x268   :  { %3366 = vmatprep.subr.bf16.mxu1 %v3365_v37  ;;  %v3401_v36 = vpack.c.bf16 %v651_v35, %v650_v34  ;;  %v4008_v34 = vld [vmem:[%s4280_s2 + $0x8] sm:$0xff] }
 0x269   :  { %v982_v35 = vrot.slane %v4008_v34, %v3893_v55 }
 0x26b   :  { %3368 = vmatpush3.bf16.msra.mxu1 %v3365_v37  ;;  %v652_v37 = vld [vmem:[#allocation2 + $0x1d0] sm:$0xff] }
 0x26c   :  { %3370 = vmatprep.subr.bf16.mxu1 %v3369_v56  ;;  %v3405_v39 = vpack.c.bf16 %v653_v38, %v652_v37  ;;  %v2264_v37 = vld [vmem:[%s4281_s3 + $0x28] sm:$0xff] }
 0x26f   :  { %3372 = vmatpush3.bf16.msra.mxu1 %v3369_v56  ;;  %v654_v56 = vld [vmem:[#allocation2 + $0x1e0] sm:$0xff] }
 0x270   :  { %3374 = vmatprep.subr.bf16.mxu1 %v3373_v20  ;;  %v3409_v41 = vpack.c.bf16 %v655_v40, %v654_v56  ;;  %v2263_v56 = vld [vmem:[%s4281_s3 + $0x20] sm:$0xff] }
 0x273   :  { %3376 = vmatpush3.bf16.msra.mxu1 %v3373_v20  ;;  %v656_v20 = vld [vmem:[#allocation2 + $0x1f0] sm:$0xff] }
 0x274   :  { %3378 = vmatprep.subr.bf16.mxu1 %v3377_v21  ;;  %v3413_v42 = vpack.c.bf16 %v657_v22, %v656_v20 }
 0x277   :  { %3380 = vmatpush3.bf16.msra.mxu1 %v3377_v21  ;;  %v861_v21 = vld [vmem:[#allocation2 + $0x280] sm:$0xff] }
 0x278   :  { %3382 = vmatprep.subr.bf16.mxu1 %v3381_v43  ;;  %v3417_v27 = vpack.c.bf16 %v862_v23, %v861_v21 }
 0x27b   :  { %3384 = vmatpush3.bf16.msra.mxu1 %v3381_v43  ;;  %v863_v43 = vld [vmem:[#allocation2 + $0x290] sm:$0xff] }
 0x27c   :  { %3386 = vmatprep.subr.bf16.mxu1 %v3385_v46  ;;  %v3421_v45 = vpack.c.bf16 %v864_v44, %v863_v43 }
 0x331   :  { %v617_v52 = vpop.f32.mrb[2].mxu1 }
 0x332   :  { %v624_v53 = vrot.slane %v617_v52, %v3893_v55  ;;  %v2773_v57 = vpop.f32.mrb[3].mxu1  ;;  %v632_v58 = vrot.slane %v617_v52, %v3947_v51  ;;  %v867_v52 = vld [vmem:[#allocation2 + $0x2b0] sm:$0xff] }
 0x334   :  { %v625_v59 = vmul.f32 %v624_v53, %v3910_v63  ;;  %v626_v61 = vmul.f32 %v624_v53, %v3905_v60  ;;  %v627_v62 = vmul.f32 %v624_v53, %v3924_v12  ;;  %v628_v1 = vmul.f32 %v624_v53, %v3917_v5  ;;  %v645_v63 = vld [vmem:[#allocation2 + $0x198] sm:$0xff] }
 0x335   :  { %v3389_v24 = vpack.c.bf16 %v645_v63, %v644_v14  ;;  %v868_v53 = vld [vmem:[#allocation2 + $0x2b8] sm:$0xff]  ;;  %v1025_v63 = vld [vmem:[#allocation2 + $0x510] sm:$0xff] }
 0x336   :  { %v633_v2 = vadd.f32 %v632_v58, %v625_v59  ;;  %v634_v3 = vadd.f32 %v632_v58, %v626_v61  ;;  %v635_v4 = vadd.f32 %v632_v58, %v627_v62  ;;  %v636_v6 = vadd.f32 %v632_v58, %v628_v1  ;;  %v869_v59 = vld [vmem:[#allocation2 + $0x2c0] sm:$0xff]  ;;  %v870_v61 = vld [vmem:[#allocation2 + $0x2c8] sm:$0xff]  ;;  %v871_v1 = vld [vmem:[#allocation2 + $0x2d0] sm:$0xff] }
 0x337   :  { %v3429_v58 = vpack.c.bf16 %v868_v53, %v867_v52  ;;  %v3433_v62 = vpack.c.bf16 %v870_v61, %v869_v59 }
 0x338   :  { %v3955_v7 = vmax.f32 %v633_v2, 0.0  ;;  %v3957_v8 = vmax.f32 %v634_v3, 0.0  ;;  %v3959_v9 = vmax.f32 %v635_v4, 0.0  ;;  %v3961_v13 = vmax.f32 %v636_v6, 0.0  ;;  %v872_v2 = vld [vmem:[#allocation2 + $0x2d8] sm:$0xff]  ;;  %v873_v4 = vld [vmem:[#allocation2 + $0x2e0] sm:$0xff] }
 0x339   :  { %v3437_v3 = vpack.c.bf16 %v872_v2, %v871_v1  ;;  %v874_v6 = vld [vmem:[#allocation2 + $0x2e8] sm:$0xff] }
 0x33a   :  { %v679_v60 = vrot.slane %v3955_v7, 1  ;;  %v680_v12 = vrot.slane %v3957_v8, 1  ;;  %v682_v5 = vrot.slane %v3959_v9, 1  ;;  %v684_v15 = vrot.slane %v3961_v13, 1 }
 0x33b   :  { %v878_v16 = vrot.slane %v3957_v8, 2  ;;  %v880_v17 = vrot.slane %v3959_v9, 2  ;;  %v882_v18 = vrot.slane %v3961_v13, 2  ;;  %v877_v49 = vrot.slane %v3955_v7, 2 }
 0x33c   :  { %v681_v10 = vsel %vm82_vm0, %v679_v60, %v680_v12  ;;  %v683_v19 = vsel %vm82_vm0, %v680_v12, %v682_v5  ;;  %v685_v29 = vsel %vm82_vm0, %v682_v5, %v684_v15  ;;  %v1026_v60 = vld [vmem:[#allocation2 + $0x518] sm:$0xff]  ;;  %v1027_v5 = vld [vmem:[#allocation2 + $0x520] sm:$0xff] }
 0x33d   :  { %2806 = vmatprep.mubr.f32.mxu1 %v681_v10  ;;  %v3975_v26 = vsel %vm281_vm1, %v878_v16, %v880_v17  ;;  %v3980_v28 = vsel %vm281_vm1, %v880_v17, %v882_v18  ;;  %v879_v57 = vsel %vm281_vm1, %v877_v49, %v878_v16  ;;  %v3453_v12 = vpack.c.bf16 %v1026_v60, %v1025_v63  ;;  %v1029_v17 = vld [vmem:[#allocation2 + $0x530] sm:$0xff]  ;;  %v1030_v10 = vld [vmem:[#allocation2 + $0x538] sm:$0xff] }
 0x33e   :  { %2807 = vmatmul.mubr.f32.vlgmr.msra.gmra.mrb[4].mxu1 %v683_v19  ;;  %v3459_v19 = vpack.c.bf16 %v1030_v10, %v1029_v17  ;;  %v1133_v17 = vld [vmem:[#allocation2 + $0x688] sm:$0xff] }
 0x33f   :  { %3388 = vmatpush3.bf16.msra.mxu1 %v3385_v46  ;;  %2809 = vmatprep.mubr.f32.mxu1 %v685_v29  ;;  %v865_v46 = vld [vmem:[#allocation2 + $0x2a0] sm:$0xff]  ;;  %v1036_v29 = vld [vmem:[#allocation2 + $0x568] sm:$0xff] }
 0x340   :  { %3390 = vmatprep.subr.bf16.mxu1 %v3389_v24  ;;  %v3425_v50 = vpack.c.bf16 %v866_v47, %v865_v46  ;;  %3454 = vmatpush3.bf16.msra.mxu0 %v3453_v12 }
 0x341   :  { %3455 = vmatprep.subr.bf16.mxu0 %v3770_v0 }
 0x342   :  { %2810 = vmatmul.mubr.f32.gmra.mrb[6].mxu1 %v684_v15  ;;  %v1028_v15 = vld [vmem:[#allocation2 + $0x528] sm:$0xff] }
 0x343   :  { %3392 = vmatpush3.bf16.msra.mxu1 %v3389_v24  ;;  %2844 = vmatprep.mubr.f32.mxu1 %v3955_v7  ;;  %v3441_v7 = vpack.c.bf16 %v874_v6, %v873_v4  ;;  %v3456_v16 = vpack.c.bf16 %v1028_v15, %v1027_v5 }
 0x344   :  { %3394 = vmatprep.subr.bf16.mxu1 %v3393_v30 }
 0x345   :  { %3457 = vmatpush3.bf16.msra.mxu0 %v3456_v16  ;;  %v1132_v16 = vld [vmem:[#allocation2 + $0x680] sm:$0xff] }
 0x346   :  { %3458 = vmatprep.subr.bf16.mxu0 %v3770_v0  ;;  %v3474_v10 = vpack.c.bf16 %v1133_v17, %v1132_v16  ;;  %v1266_v16 = vld [vmem:[#allocation2 + $0x3d0] sm:$0xff]  ;;  %v1267_v17 = vld [vmem:[#allocation2 + $0x3d8] sm:$0xff] }
 0x347   :  { %3396 = vmatpush3.bf16.msra.mxu1 %v3393_v30 }
 0x348   :  { %3398 = vmatprep.subr.bf16.mxu1 %v3397_v33 }
 0x349   :  { %3460 = vmatpush3.bf16.msra.mxu0 %v3459_v19  ;;  %v1134_v19 = vld [vmem:[#allocation2 + $0x690] sm:$0xff] }
 0x34a   :  { %3461 = vmatprep.subr.bf16.mxu0 %v3770_v0 }
 0x34b   :  { %3400 = vmatpush3.bf16.msra.mxu1 %v3397_v33  ;;  %v3471_v33 = vpack.c.bf16 %v1038_v32, %v1037_v31  ;;  %v1141_v31 = vld [vmem:[#allocation2 + $0x6c8] sm:$0xff] }
 0x34c   :  { %3402 = vmatprep.subr.bf16.mxu1 %v3401_v36 }
 0x34f   :  { %3404 = vmatpush3.bf16.msra.mxu1 %v3401_v36 }
 0x350   :  { %3406 = vmatprep.subr.bf16.mxu1 %v3405_v39 }
 0x353   :  { %3408 = vmatpush3.bf16.msra.mxu1 %v3405_v39 }
 0x354   :  { %3410 = vmatprep.subr.bf16.mxu1 %v3409_v41 }
 0x357   :  { %3412 = vmatpush3.bf16.msra.mxu1 %v3409_v41 }
 0x358   :  { %3414 = vmatprep.subr.bf16.mxu1 %v3413_v42 }
 0x35b   :  { %3416 = vmatpush3.bf16.msra.mxu1 %v3413_v42  ;;  %v2266_v42 = vld [vmem:[%s4281_s3 + $0x38] sm:$0x3f] }
 0x35c   :  { %3418 = vmatprep.subr.bf16.mxu1 %v3417_v27 }
 0x35e   :  { %2845 = vmatmul.mubr.f32.vlgmr.msra.gmra.mrb[4].mxu1 %v3957_v8  ;;  %v875_v8 = vld [vmem:[#allocation2 + $0x2f0] sm:$0xff] }
 0x35f   :  { %2847 = vmatprep.mubr.f32.mxu1 %v3959_v9  ;;  %3420 = vmatpush3.bf16.msra.mxu1 %v3417_v27  ;;  %v876_v9 = vld [vmem:[#allocation2 + $0x2f8] sm:$0xff]  ;;  %v2265_v27 = vld [vmem:[%s4281_s3 + $0x30] sm:$0xff] }
 0x360   :  { %3422 = vmatprep.subr.bf16.mxu1 %v3421_v45  ;;  %v3445_v14 = vpack.c.bf16 %v876_v9, %v875_v8 }
 0x362   :  { %2848 = vmatmul.mubr.f32.gmra.mrb[6].mxu1 %v3961_v13  ;;  %v1031_v13 = vld [vmem:[#allocation2 + $0x540] sm:$0xff] }
 0x363   :  { %3424 = vmatpush3.bf16.msra.mxu1 %v3421_v45  ;;  %2882 = vmatprep.mubr.f32.mxu1 %v879_v57 }
 0x364   :  { %3426 = vmatprep.subr.bf16.mxu1 %v3425_v50 }
 0x367   :  { %3428 = vmatpush3.bf16.msra.mxu1 %v3425_v50 }
 0x368   :  { %3430 = vmatprep.subr.bf16.mxu1 %v3429_v58 }
 0x36b   :  { %3432 = vmatpush3.bf16.msra.mxu1 %v3429_v58 }
 0x36c   :  { %3434 = vmatprep.subr.bf16.mxu1 %v3433_v62 }
 0x36f   :  { %3436 = vmatpush3.bf16.msra.mxu1 %v3433_v62 }
 0x370   :  { %3438 = vmatprep.subr.bf16.mxu1 %v3437_v3 }
 0x373   :  { %3440 = vmatpush3.bf16.msra.mxu1 %v3437_v3 }
 0x374   :  { %3442 = vmatprep.subr.bf16.mxu1 %v3441_v7 }
 0x377   :  { %3444 = vmatpush3.bf16.msra.mxu1 %v3441_v7 }
 0x378   :  { %3446 = vmatprep.subr.bf16.mxu1 %v3445_v14 }
 0x37b   :  { %3448 = vmatpush3.bf16.msra.mxu1 %v3445_v14 }
 0x37c   :  { %3593 = vmatprep.subr.bf16.mxu1 %v3770_v0 }
 0x37e   :  { %2883 = vmatmul.mubr.f32.vlgmr.msra.gmra.mrb[4].mxu1 %v3975_v26  ;;  %v3465_v26 = vpack.c.bf16 %v1034_v25, %v1033_v11  ;;  %v1137_v11 = vld [vmem:[#allocation2 + $0x6a8] sm:$0xff] }
 0x37f   :  { %2885 = vmatprep.mubr.f32.mxu1 %v3980_v28  ;;  %v1035_v28 = vld [vmem:[#allocation2 + $0x560] sm:$0xff] }
 0x380   :  { %v3468_v30 = vpack.c.bf16 %v1036_v29, %v1035_v28  ;;  %v1139_v28 = vld [vmem:[#allocation2 + $0x6b8] sm:$0xff] }
 0x382   :  { %2886 = vmatmul.mubr.f32.gmra.mrb[6].mxu1 %v882_v18  ;;  %v1032_v18 = vld [vmem:[#allocation2 + $0x548] sm:$0xff] }
 0x383   :  { %3104 = vmatprep.mubr.msk.f32.mxu1 %vm3771_vm2, %v3772_v48  ;;  %v3462_v24 = vpack.c.bf16 %v1032_v18, %v1031_v13  ;;  %v1135_v13 = vld [vmem:[#allocation2 + $0x698] sm:$0xff] }
 0x384   :  { %v3477_v18 = vpack.c.bf16 %v1135_v13, %v1134_v19  ;;  %v1268_v19 = vld [vmem:[#allocation2 + $0x3e0] sm:$0xff]  ;;  %v1269_v13 = vld [vmem:[#allocation2 + $0x3e8] sm:$0xff] }
 0x385   :  { %3463 = vmatpush3.bf16.msra.mxu0 %v3462_v24  ;;  %v1136_v24 = vld [vmem:[#allocation2 + $0x6a0] sm:$0xff] }
 0x386   :  { %3464 = vmatprep.subr.bf16.mxu0 %v3770_v0  ;;  %v3480_v25 = vpack.c.bf16 %v1137_v11, %v1136_v24  ;;  %v1270_v24 = vld [vmem:[#allocation2 + $0x3f0] sm:$0xff]  ;;  %v1271_v11 = vld [vmem:[#allocation2 + $0x3f8] sm:$0xff] }
 0x389   :  { %3466 = vmatpush3.bf16.msra.mxu0 %v3465_v26  ;;  %v1138_v26 = vld [vmem:[#allocation2 + $0x6b0] sm:$0xff] }
 0x38a   :  { %3467 = vmatprep.subr.bf16.mxu0 %v3770_v0  ;;  %v3483_v29 = vpack.c.bf16 %v1139_v28, %v1138_v26  ;;  %v1239_v26 = vld [vmem:[#allocation2 + $0x300] sm:$0xff]  ;;  %v1240_v28 = vld [vmem:[#allocation2 + $0x308] sm:$0xff] }
 0x38d   :  { %3469 = vmatpush3.bf16.msra.mxu0 %v3468_v30  ;;  %v1140_v30 = vld [vmem:[#allocation2 + $0x6c0] sm:$0xff] }
 0x38e   :  { %3470 = vmatprep.subr.bf16.mxu0 %v3770_v0  ;;  %v3486_v32 = vpack.c.bf16 %v1141_v31, %v1140_v30  ;;  %v1620_v30 = vld [vmem:[#allocation2 + $0x580] sm:$0xff]  ;;  %v1621_v31 = vld [vmem:[#allocation2 + $0x588] sm:$0xff] }
 0x391   :  { %3472 = vmatpush3.bf16.msra.mxu0 %v3471_v33  ;;  %v1142_v33 = vld [vmem:[#allocation2 + $0x6d0] sm:$0xff] }
 0x392   :  { %3473 = vmatprep.subr.bf16.mxu0 %v3770_v0 }
 0x451   :  { %v2884_v36 = vpop.f32.mrb[4].mxu1 }
 0x452   :  { %v4015_v38 = vadd.f32 %v2884_v36, %v982_v35  ;;  %v954_v39 = vpop.f32.mrb[5].mxu1 }
 0x453   :  { %v4020_v40 = vadd.f32 %v982_v35, %v954_v39  ;;  %v1145_v39 = vld [vmem:[#allocation2 + $0x6e8] sm:$0xff] }
 0x454   :  { %v993_v41 = vmul.f32 %v2264_v37, %v4015_v38  ;;  %v1144_v37 = vld [vmem:[#allocation2 + $0x6e0] sm:$0xff] }
 0x455   :  { %v992_v20 = vmul.f32 %v2263_v56, %v4020_v40  ;;  %v2887_v22 = vpop.f32.mrb[6].mxu1  ;;  %v3492_v56 = vpack.c.bf16 %v1145_v39, %v1144_v37 }
 0x456   :  { %v4027_v21 = vadd.f32 %v2887_v22, %v982_v35  ;;  %v964_v23 = vpop.f32.mrb[7].mxu1  ;;  %v1008_v43 = vmul.f32 %v993_v41, %v4015_v38 }
 0x457   :  { %v1007_v44 = vmul.f32 %v992_v20, %v4020_v40  ;;  %v4034_v45 = vadd.f32 %v982_v35, %v964_v23  ;;  %v996_v47 = vadd.f32 %v993_v41, %v992_v20  ;;  %v1143_v35 = vld [vmem:[#allocation2 + $0x6d8] sm:$0xff]  ;;  %v1146_v41 = vld [vmem:[#allocation2 + $0x6f0] sm:$0xff]  ;;  %v1257_v23 = vld [vmem:[#allocation2 + $0x388] sm:$0xff] }
 0x458   :  { %v995_v46 = vmul.f32 %v2266_v42, %v4027_v21  ;;  %v3489_v36 = vpack.c.bf16 %v1143_v35, %v1142_v33  ;;  %v1147_v20 = vld [vmem:[#allocation2 + $0x6f8] sm:$0xff]  ;;  %v1256_v42 = vld [vmem:[#allocation2 + $0x380] sm:$0xff] }
 0x459   :  { %v994_v49 = vmul.f32 %v2265_v27, %v4034_v45  ;;  %v1011_v52 = vadd.f32 %v1008_v43, %v1007_v44  ;;  %v3495_v22 = vpack.c.bf16 %v1147_v20, %v1146_v41  ;;  %v3497_v27 = vpack.c.bf16 %v1257_v23, %v1256_v42 }
 0x45a   :  { %v1010_v50 = vmul.f32 %v995_v46, %v4027_v21  ;;  %v999_v58 = vsel %vm998_vm4, %v995_v46, 0.0 }
 0x45b   :  { %v997_v53 = vadd.f32 %v996_v47, %v994_v49  ;;  %v1009_v57 = vmul.f32 %v994_v49, %v4034_v45 }
 0x45c   :  { %v1013_v62 = vsel %vm998_vm4, %v1010_v50, 0.0 }
 0x45d   :  { %v1000_v59 = vadd.f32 %v999_v58, %v997_v53  ;;  %v1012_v61 = vadd.f32 %v1011_v52, %v1009_v57 }
 0x45f   :  { %v1001_v1 = vrot.slane %v1000_v59, 4  ;;  %v1014_v2 = vadd.f32 %v1013_v62, %v1012_v61 }
 0x461   :  { %v1002_v3 = vadd.f32 %v1001_v1, %v1000_v59  ;;  %v1015_v4 = vrot.slane %v1014_v2, 4 }
 0x463   :  { %v1003_v6 = vrot.slane %v1002_v3, 2  ;;  %v1016_v7 = vadd.f32 %v1015_v4, %v1014_v2  ;;  %v1258_v2 = vld [vmem:[#allocation2 + $0x390] sm:$0xff] }
 0x465   :  { %v1017_v8 = vrot.slane %v1016_v7, 2  ;;  %v1004_v9 = vadd.f32 %v1003_v6, %v1002_v3  ;;  %v1259_v3 = vld [vmem:[#allocation2 + $0x398] sm:$0xff] }
 0x466   :  { %v3501_v6 = vpack.c.bf16 %v1259_v3, %v1258_v2 }
 0x467   :  { %v1005_v14 = vrot.slane %v1004_v9, 1  ;;  %v1018_v63 = vadd.f32 %v1017_v8, %v1016_v7  ;;  %v1260_v8 = vld [vmem:[#allocation2 + $0x3a0] sm:$0xff] }
 0x469   :  { %v1019_v60 = vrot.slane %v1018_v63, 1  ;;  %v1006_v12 = vadd.f32 %v1005_v14, %v1004_v9  ;;  %v1261_v9 = vld [vmem:[#allocation2 + $0x3a8] sm:$0xff] }
 0x46a   :  { %v3505_v14 = vpack.c.bf16 %v1261_v9, %v1260_v8  ;;  %v1246_v8 = vld [vmem:[#allocation2 + $0x338] sm:$0xff] }
 0x46b   :  { %v1020_v5 = vadd.f32 %v1019_v60, %v1018_v63  ;;  %v1262_v63 = vld [vmem:[#allocation2 + $0x3b0] sm:$0xff]  ;;  %v1263_v60 = vld [vmem:[#allocation2 + $0x3b8] sm:$0xff] }
 0x46d   :  { %v1021_v15 = vsel %vm423_vm3, %v1006_v12, %v1020_v5  ;;  %v3509_v12 = vpack.c.bf16 %v1263_v60, %v1262_v63  ;;  %v1264_v5 = vld [vmem:[#allocation2 + $0x3c0] sm:$0xff]  ;;  %v1248_v63 = vld [vmem:[#allocation2 + $0x348] sm:$0xff] }
 0x46e   :  { %2921 = vmatmul.mubr.f32.vlgmr.msra.gmra.mrb[4].mxu0 %v1021_v15  ;;  %v1265_v15 = vld [vmem:[#allocation2 + $0x3c8] sm:$0xff] }
 0x46f   :  { %2955 = vmatprep.mubr.msk.f32.mxu0 %vm3771_vm2, %v3772_v48  ;;  %3475 = vmatpush3.bf16.msra.mxu0 %v3474_v10  ;;  %v3517_v10 = vpack.c.bf16 %v1267_v17, %v1266_v16  ;;  %v1252_v16 = vld [vmem:[#allocation2 + $0x368] sm:$0xff] }
 0x470   :  { %3476 = vmatprep.subr.bf16.mxu0 %v3770_v0 }
 0x473   :  { %3478 = vmatpush3.bf16.msra.mxu0 %v3477_v18  ;;  %v3521_v18 = vpack.c.bf16 %v1269_v13, %v1268_v19  ;;  %v1254_v19 = vld [vmem:[#allocation2 + $0x378] sm:$0xff] }
 0x474   :  { %3479 = vmatprep.subr.bf16.mxu0 %v3770_v0 }
 0x477   :  { %3481 = vmatpush3.bf16.msra.mxu0 %v3480_v25  ;;  %v3525_v25 = vpack.c.bf16 %v1271_v11, %v1270_v24  ;;  %v1459_v24 = vld [vmem:[#allocation2 + $0x408] sm:$0xff] }
 0x478   :  { %3482 = vmatprep.subr.bf16.mxu0 %v3770_v0 }
 0x47b   :  { %3484 = vmatpush3.bf16.msra.mxu0 %v3483_v29  ;;  %v3529_v29 = vpack.c.bf16 %v1240_v28, %v1239_v26  ;;  %v1461_v26 = vld [vmem:[#allocation2 + $0x418] sm:$0xff] }
 0x47c   :  { %3485 = vmatprep.subr.bf16.mxu0 %v3770_v0 }
 0x47f   :  { %3487 = vmatpush3.bf16.msra.mxu0 %v3486_v32  ;;  %v3594_v32 = vpack.c.bf16 %v1621_v31, %v1620_v30  ;;  %v1463_v30 = vld [vmem:[#allocation2 + $0x428] sm:$0xff] }
 0x480   :  { %3488 = vmatprep.subr.bf16.mxu0 %v3770_v0 }
 0x481   :  { %3595 = vmatpush3.bf16.msra.mxu1 %v3594_v32 }
 0x482   :  { %3596 = vmatprep.subr.bf16.mxu1 %v3770_v0 }
 0x483   :  { %3490 = vmatpush3.bf16.msra.mxu0 %v3489_v36 }
 0x484   :  { %3491 = vmatprep.subr.bf16.mxu0 %v3770_v0 }
 0x487   :  { %3493 = vmatpush3.bf16.msra.mxu0 %v3492_v56 }
 0x488   :  { %3494 = vmatprep.subr.bf16.mxu0 %v3770_v0 }
 0x48b   :  { %3496 = vmatpush3.bf16.msra.mxu0 %v3495_v22 }
 0x48c   :  { %3498 = vmatprep.subr.bf16.mxu0 %v3497_v27 }
 0x541   :  { %v1105_v43 = vpop.f32.mrb[4].mxu0 }
 0x542   :  { %v1109_v44 = vmul.f32 0.0034722222, %v1105_v43  ;;  %v2922_v46 = vpop.f32.mrb[5].mxu0 }
 0x544   :  { %v1110_v47 = vmul.f32 %v1109_v44, %v1109_v44 }
 0x546   :  { %v1112_v49 = vrot.slane %v1110_v47, 7 }
 0x548   :  { %v1114_v50 = vsub.f32 %v1109_v44, %v1112_v49  ;;  %v1241_v49 = vld [vmem:[#allocation2 + $0x310] sm:$0xff] }
 0x54a   :  { %v1115_v52 = vmax.f32 %v1114_v50, 0.0 }
 0x54c   :  { %v1116_v53 = vadd.f32 1e-05, %v1115_v52 }
 0x54e   :  { %3715 = vrsqrt.f32 %v1116_v53 }
 0x558   :  { %v3716_v57 = vpop.eup %3715 }
 0x559   :  { %v1118_v58 = vmul.f32 %v3716_v57, %v4008_v34 }
 0x55b   :  { %v1120_v59 = vrot.slane %v1118_v58, 1 }
 0x55d   :  { %v1122_v61 = vmul.f32 %v1120_v59, %v1109_v44 }
 0x55f   :  { %v1124_v62 = vrot.slane %v1122_v61, 6 }
 0x561   :  { %v1126_v1 = vsub.f32 %v4008_v34, %v1124_v62  ;;  %v3513_v34 = vpack.c.bf16 %v1265_v15, %v1264_v5  ;;  %v1243_v62 = vld [vmem:[#allocation2 + $0x320] sm:$0xff]  ;;  %v1250_v5 = vld [vmem:[#allocation2 + $0x358] sm:$0xff] }
 0x563   :  { %v1128_v4 = vrot.slane %v1126_v1, 1  ;;  %v1244_v1 = vld [vmem:[#allocation2 + $0x328] sm:$0xff] }
 0x565   :  { %v1130_v7 = vsel %vm423_vm3, %v1120_v59, %v1128_v4 }
 0x566   :  { %2956 = vmatmul.mubr.f32.vlgmr.msra.gmra.mrb[6].mxu0 %v1130_v7  ;;  %v1245_v7 = vld [vmem:[#allocation2 + $0x330] sm:$0xff] }
 0x567   :  { %3500 = vmatpush3.bf16.msra.mxu0 %v3497_v27  ;;  %v3541_v9 = vpack.c.bf16 %v1246_v8, %v1245_v7  ;;  %v1634_v7 = vld [vmem:[#allocation2 + $0x5f0] sm:$0xff]  ;;  %v1635_v8 = vld [vmem:[#allocation2 + $0x5f8] sm:$0xff] }
 0x568   :  { %3502 = vmatprep.subr.bf16.mxu0 %v3501_v6 }
 0x56b   :  { %3504 = vmatpush3.bf16.msra.mxu0 %v3501_v6  ;;  %v3537_v6 = vpack.c.bf16 %v1244_v1, %v1243_v62  ;;  %v1630_v62 = vld [vmem:[#allocation2 + $0x5d0] sm:$0xff]  ;;  %v1631_v1 = vld [vmem:[#allocation2 + $0x5d8] sm:$0xff] }
 0x56c   :  { %3506 = vmatprep.subr.bf16.mxu0 %v3505_v14 }
 0x56f   :  { %3508 = vmatpush3.bf16.msra.mxu0 %v3505_v14  ;;  %v1247_v14 = vld [vmem:[#allocation2 + $0x340] sm:$0xff] }
 0x570   :  { %3510 = vmatprep.subr.bf16.mxu0 %v3509_v12  ;;  %v3545_v60 = vpack.c.bf16 %v1248_v63, %v1247_v14  ;;  %v4113_v14 = vld [vmem:[%s4280_s2 + $0x10] sm:$0xff] }
 0x571   :  { %v1579_v63 = vrot.slane %v4113_v14, %v3893_v55 }
 0x573   :  { %3512 = vmatpush3.bf16.msra.mxu0 %v3509_v12  ;;  %v1249_v12 = vld [vmem:[#allocation2 + $0x350] sm:$0xff] }
 0x574   :  { %3514 = vmatprep.subr.bf16.mxu0 %v3513_v34  ;;  %v3549_v15 = vpack.c.bf16 %v1250_v5, %v1249_v12  ;;  %v2269_v12 = vld [vmem:[%s4281_s3 + $0x48] sm:$0xff] }
 0x577   :  { %3516 = vmatpush3.bf16.msra.mxu0 %v3513_v34  ;;  %v1251_v34 = vld [vmem:[#allocation2 + $0x360] sm:$0xff] }
 0x578   :  { %3518 = vmatprep.subr.bf16.mxu0 %v3517_v10  ;;  %v3553_v17 = vpack.c.bf16 %v1252_v16, %v1251_v34  ;;  %v2268_v34 = vld [vmem:[%s4281_s3 + $0x40] sm:$0xff] }
 0x57b   :  { %3520 = vmatpush3.bf16.msra.mxu0 %v3517_v10  ;;  %v1253_v10 = vld [vmem:[#allocation2 + $0x370] sm:$0xff] }
 0x57c   :  { %3522 = vmatprep.subr.bf16.mxu0 %v3521_v18  ;;  %v3557_v13 = vpack.c.bf16 %v1254_v19, %v1253_v10 }
 0x57f   :  { %3524 = vmatpush3.bf16.msra.mxu0 %v3521_v18  ;;  %v1458_v18 = vld [vmem:[#allocation2 + $0x400] sm:$0xff] }
 0x580   :  { %3526 = vmatprep.subr.bf16.mxu0 %v3525_v25  ;;  %v3561_v11 = vpack.c.bf16 %v1459_v24, %v1458_v18 }
 0x583   :  { %3528 = vmatpush3.bf16.msra.mxu0 %v3525_v25  ;;  %v1460_v25 = vld [vmem:[#allocation2 + $0x410] sm:$0xff] }
 0x584   :  { %3530 = vmatprep.subr.bf16.mxu0 %v3529_v29  ;;  %v3565_v28 = vpack.c.bf16 %v1461_v26, %v1460_v25 }
 0x639   :  { %v1214_v33 = vpop.f32.mrb[6].mxu0 }
 0x63a   :  { %v1221_v35 = vrot.slane %v1214_v33, %v3893_v55  ;;  %v2957_v36 = vpop.f32.mrb[7].mxu0  ;;  %v1229_v37 = vrot.slane %v1214_v33, %v3947_v51  ;;  %v1464_v33 = vld [vmem:[#allocation2 + $0x430] sm:$0xff] }
 0x63c   :  { %v1222_v39 = vmul.f32 %v1221_v35, %v4020_v40  ;;  %v1223_v56 = vmul.f32 %v1221_v35, %v4015_v38  ;;  %v1224_v41 = vmul.f32 %v1221_v35, %v4034_v45  ;;  %v1225_v20 = vmul.f32 %v1221_v35, %v4027_v21  ;;  %v1242_v40 = vld [vmem:[#allocation2 + $0x318] sm:$0xff] }
 0x63d   :  { %v3533_v61 = vpack.c.bf16 %v1242_v40, %v1241_v49  ;;  %v1465_v35 = vld [vmem:[#allocation2 + $0x438] sm:$0xff]  ;;  %v1622_v40 = vld [vmem:[#allocation2 + $0x590] sm:$0xff] }
 0x63e   :  { %v1230_v22 = vadd.f32 %v1229_v37, %v1222_v39  ;;  %v1231_v42 = vadd.f32 %v1229_v37, %v1223_v56  ;;  %v1232_v23 = vadd.f32 %v1229_v37, %v1224_v41  ;;  %v1233_v27 = vadd.f32 %v1229_v37, %v1225_v20  ;;  %v1466_v39 = vld [vmem:[#allocation2 + $0x440] sm:$0xff]  ;;  %v1467_v56 = vld [vmem:[#allocation2 + $0x448] sm:$0xff]  ;;  %v1468_v20 = vld [vmem:[#allocation2 + $0x450] sm:$0xff] }
 0x63f   :  { %v3573_v37 = vpack.c.bf16 %v1465_v35, %v1464_v33  ;;  %v3577_v41 = vpack.c.bf16 %v1467_v56, %v1466_v39 }
 0x640   :  { %v4060_v43 = vmax.f32 %v1230_v22, 0.0  ;;  %v4062_v44 = vmax.f32 %v1231_v42, 0.0  ;;  %v4064_v46 = vmax.f32 %v1232_v23, 0.0  ;;  %v4066_v47 = vmax.f32 %v1233_v27, 0.0  ;;  %v1469_v22 = vld [vmem:[#allocation2 + $0x458] sm:$0xff]  ;;  %v1470_v23 = vld [vmem:[#allocation2 + $0x460] sm:$0xff] }
 0x641   :  { %v3581_v42 = vpack.c.bf16 %v1469_v22, %v1468_v20  ;;  %v1471_v27 = vld [vmem:[#allocation2 + $0x468] sm:$0xff] }
 0x642   :  { %v1276_v38 = vrot.slane %v4060_v43, 1  ;;  %v1277_v45 = vrot.slane %v4062_v44, 1  ;;  %v1279_v21 = vrot.slane %v4064_v46, 1  ;;  %v1281_v50 = vrot.slane %v4066_v47, 1 }
 0x643   :  { %v1475_v52 = vrot.slane %v4062_v44, 2  ;;  %v1477_v53 = vrot.slane %v4064_v46, 2  ;;  %v1479_v57 = vrot.slane %v4066_v47, 2  ;;  %v1474_v31 = vrot.slane %v4060_v43, 2 }
 0x644   :  { %v1278_v58 = vsel %vm82_vm0, %v1276_v38, %v1277_v45  ;;  %v1280_v59 = vsel %vm82_vm0, %v1277_v45, %v1279_v21  ;;  %v1282_v4 = vsel %vm82_vm0, %v1279_v21, %v1281_v50  ;;  %v1623_v38 = vld [vmem:[#allocation2 + $0x598] sm:$0xff]  ;;  %v1624_v21 = vld [vmem:[#allocation2 + $0x5a0] sm:$0xff] }
 0x645   :  { %2990 = vmatprep.mubr.f32.mxu0 %v1278_v58  ;;  %v4080_v2 = vsel %vm281_vm1, %v1475_v52, %v1477_v53  ;;  %v4085_v3 = vsel %vm281_vm1, %v1477_v53, %v1479_v57  ;;  %v1476_v36 = vsel %vm281_vm1, %v1474_v31, %v1475_v52  ;;  %v3597_v45 = vpack.c.bf16 %v1623_v38, %v1622_v40  ;;  %v1626_v53 = vld [vmem:[#allocation2 + $0x5b0] sm:$0xff]  ;;  %v1627_v58 = vld [vmem:[#allocation2 + $0x5b8] sm:$0xff] }
 0x646   :  { %2991 = vmatmul.mubr.f32.vlgmr.msra.gmra.mrb[8].mxu0 %v1280_v59  ;;  %v3603_v59 = vpack.c.bf16 %v1627_v58, %v1626_v53  ;;  %v1730_v53 = vld [vmem:[#allocation2 + $0x708] sm:$0xff] }
 0x647   :  { %3532 = vmatpush3.bf16.msra.mxu0 %v3529_v29  ;;  %2993 = vmatprep.mubr.f32.mxu0 %v1282_v4  ;;  %v1462_v29 = vld [vmem:[#allocation2 + $0x420] sm:$0xff]  ;;  %v1633_v4 = vld [vmem:[#allocation2 + $0x5e8] sm:$0xff] }
 0x648   :  { %3534 = vmatprep.subr.bf16.mxu0 %v3533_v61  ;;  %v3569_v32 = vpack.c.bf16 %v1463_v30, %v1462_v29  ;;  %3598 = vmatpush3.bf16.msra.mxu1 %v3597_v45 }
 0x649   :  { %3599 = vmatprep.subr.bf16.mxu1 %v3770_v0 }
 0x64a   :  { %2994 = vmatmul.mubr.f32.gmra.mrb[10].mxu0 %v1281_v50  ;;  %v1625_v50 = vld [vmem:[#allocation2 + $0x5a8] sm:$0xff] }
 0x64b   :  { %3536 = vmatpush3.bf16.msra.mxu0 %v3533_v61  ;;  %3028 = vmatprep.mubr.f32.mxu0 %v4060_v43  ;;  %v3585_v43 = vpack.c.bf16 %v1471_v27, %v1470_v23  ;;  %v3600_v52 = vpack.c.bf16 %v1625_v50, %v1624_v21 }
 0x64c   :  { %3538 = vmatprep.subr.bf16.mxu0 %v3537_v6 }
 0x64d   :  { %3601 = vmatpush3.bf16.msra.mxu1 %v3600_v52  ;;  %v1729_v52 = vld [vmem:[#allocation2 + $0x700] sm:$0xff] }
 0x64e   :  { %3602 = vmatprep.subr.bf16.mxu1 %v3770_v0  ;;  %v3618_v58 = vpack.c.bf16 %v1730_v53, %v1729_v52 }
 0x64f   :  { %3540 = vmatpush3.bf16.msra.mxu0 %v3537_v6 }
 0x650   :  { %3542 = vmatprep.subr.bf16.mxu0 %v3541_v9 }
 0x651   :  { %3604 = vmatpush3.bf16.msra.mxu1 %v3603_v59  ;;  %v1731_v59 = vld [vmem:[#allocation2 + $0x710] sm:$0xff] }
 0x652   :  { %3605 = vmatprep.subr.bf16.mxu1 %v3770_v0 }
 0x653   :  { %3544 = vmatpush3.bf16.msra.mxu0 %v3541_v9  ;;  %v3615_v9 = vpack.c.bf16 %v1635_v8, %v1634_v7  ;;  %v1738_v7 = vld [vmem:[#allocation2 + $0x748] sm:$0xff] }
 0x654   :  { %3546 = vmatprep.subr.bf16.mxu0 %v3545_v60 }
 0x657   :  { %3548 = vmatpush3.bf16.msra.mxu0 %v3545_v60 }
 0x658   :  { %3550 = vmatprep.subr.bf16.mxu0 %v3549_v15 }
 0x65b   :  { %3552 = vmatpush3.bf16.msra.mxu0 %v3549_v15 }
 0x65c   :  { %3554 = vmatprep.subr.bf16.mxu0 %v3553_v17 }
 0x65f   :  { %3556 = vmatpush3.bf16.msra.mxu0 %v3553_v17 }
 0x660   :  { %3558 = vmatprep.subr.bf16.mxu0 %v3557_v13 }
 0x663   :  { %3560 = vmatpush3.bf16.msra.mxu0 %v3557_v13  ;;  %v2271_v13 = vld [vmem:[%s4281_s3 + $0x58] sm:$0x3f] }
 0x664   :  { %3562 = vmatprep.subr.bf16.mxu0 %v3561_v11 }
 0x666   :  { %3029 = vmatmul.mubr.f32.vlgmr.msra.gmra.mrb[8].mxu0 %v4062_v44  ;;  %v1472_v44 = vld [vmem:[#allocation2 + $0x470] sm:$0xff] }
 0x667   :  { %3031 = vmatprep.mubr.f32.mxu0 %v4064_v46  ;;  %3564 = vmatpush3.bf16.msra.mxu0 %v3561_v11  ;;  %v1473_v46 = vld [vmem:[#allocation2 + $0x478] sm:$0xff]  ;;  %v2270_v11 = vld [vmem:[%s4281_s3 + $0x50] sm:$0xff] }
 0x668   :  { %3566 = vmatprep.subr.bf16.mxu0 %v3565_v28  ;;  %v3589_v49 = vpack.c.bf16 %v1473_v46, %v1472_v44 }
 0x66a   :  { %3032 = vmatmul.mubr.f32.gmra.mrb[10].mxu0 %v4066_v47  ;;  %v1628_v47 = vld [vmem:[#allocation2 + $0x5c0] sm:$0xff] }
 0x66b   :  { %3568 = vmatpush3.bf16.msra.mxu0 %v3565_v28  ;;  %3066 = vmatprep.mubr.f32.mxu0 %v1476_v36 }
 0x66c   :  { %3570 = vmatprep.subr.bf16.mxu0 %v3569_v32 }
 0x66f   :  { %3572 = vmatpush3.bf16.msra.mxu0 %v3569_v32 }
 0x670   :  { %3574 = vmatprep.subr.bf16.mxu0 %v3573_v37 }
 0x673   :  { %3576 = vmatpush3.bf16.msra.mxu0 %v3573_v37 }
 0x674   :  { %3578 = vmatprep.subr.bf16.mxu0 %v3577_v41 }
 0x677   :  { %3580 = vmatpush3.bf16.msra.mxu0 %v3577_v41 }
 0x678   :  { %3582 = vmatprep.subr.bf16.mxu0 %v3581_v42 }
 0x67b   :  { %3584 = vmatpush3.bf16.msra.mxu0 %v3581_v42 }
 0x67c   :  { %3586 = vmatprep.subr.bf16.mxu0 %v3585_v43 }
 0x67f   :  { %3588 = vmatpush3.bf16.msra.mxu0 %v3585_v43 }
 0x680   :  { %3590 = vmatprep.subr.bf16.mxu0 %v3589_v49 }
 0x683   :  { %3592 = vmatpush3.bf16.msra.mxu0 %v3589_v49 }
 0x684   :  { %3672 = vmatprep.subr.bf16.mxu0 %v3770_v0 }
 0x686   :  { %3067 = vmatmul.mubr.f32.vlgmr.msra.gmra.mrb[8].mxu0 %v4080_v2  ;;  %v3609_v2 = vpack.c.bf16 %v1631_v1, %v1630_v62  ;;  %v1734_v62 = vld [vmem:[#allocation2 + $0x728] sm:$0xff] }
 0x687   :  { %3069 = vmatprep.mubr.f32.mxu0 %v4085_v3  ;;  %v1632_v3 = vld [vmem:[#allocation2 + $0x5e0] sm:$0xff] }
 0x688   :  { %v3612_v6 = vpack.c.bf16 %v1633_v4, %v1632_v3  ;;  %v1736_v3 = vld [vmem:[#allocation2 + $0x738] sm:$0xff] }
 0x68a   :  { %3070 = vmatmul.mubr.f32.gmra.mrb[10].mxu0 %v1479_v57  ;;  %v1629_v57 = vld [vmem:[#allocation2 + $0x5c8] sm:$0xff] }
 0x68b   :  { %3192 = vmatprep.mubr.msk.f32.mxu0 %vm3771_vm2, %v3772_v48  ;;  %v3606_v61 = vpack.c.bf16 %v1629_v57, %v1628_v47  ;;  %v1732_v47 = vld [vmem:[#allocation2 + $0x718] sm:$0xff] }
 0x68c   :  { %v3621_v57 = vpack.c.bf16 %v1732_v47, %v1731_v59  ;;  %v1922_v59 = vld [vmem:[%s4283_s5 + $0x10] sm:$0xff]  ;;  %v1923_v47 = vld [vmem:[%s4283_s5 + $0x18] sm:$0xff] }
 0x68d   :  { %3607 = vmatpush3.bf16.msra.mxu1 %v3606_v61  ;;  %v1733_v61 = vld [vmem:[#allocation2 + $0x720] sm:$0xff] }
 0x68e   :  { %3608 = vmatprep.subr.bf16.mxu1 %v3770_v0  ;;  %v3624_v1 = vpack.c.bf16 %v1734_v62, %v1733_v61  ;;  %v1924_v61 = vld [vmem:[%s4283_s5 + $0x20] sm:$0xff]  ;;  %v1925_v62 = vld [vmem:[%s4283_s5 + $0x28] sm:$0xff] }
 0x691   :  { %3610 = vmatpush3.bf16.msra.mxu1 %v3609_v2  ;;  %v1735_v2 = vld [vmem:[#allocation2 + $0x730] sm:$0xff] }
 0x692   :  { %3611 = vmatprep.subr.bf16.mxu1 %v3770_v0  ;;  %v3627_v4 = vpack.c.bf16 %v1736_v3, %v1735_v2  ;;  %v1926_v2 = vld [vmem:[%s4283_s5 + $0x30] sm:$0xff]  ;;  %v1927_v3 = vld [vmem:[%s4283_s5 + $0x38] sm:$0xff] }
 0x695   :  { %3613 = vmatpush3.bf16.msra.mxu1 %v3612_v6  ;;  %v1737_v6 = vld [vmem:[#allocation2 + $0x740] sm:$0xff] }
 0x696   :  { %3614 = vmatprep.subr.bf16.mxu1 %v3770_v0  ;;  %v3630_v8 = vpack.c.bf16 %v1738_v7, %v1737_v6  ;;  %v1928_v6 = vld [vmem:[%s4283_s5 + $0x40] sm:$0xff]  ;;  %v1929_v7 = vld [vmem:[%s4283_s5 + $0x48] sm:$0xff] }
 0x699   :  { %3616 = vmatpush3.bf16.msra.mxu1 %v3615_v9  ;;  %v1739_v9 = vld [vmem:[#allocation2 + $0x750] sm:$0xff] }
 0x69a   :  { %3617 = vmatprep.subr.bf16.mxu1 %v3770_v0 }
 0x759   :  { %v3068_v60 = vpop.f32.mrb[8].mxu0 }
 0x75a   :  { %v4120_v5 = vadd.f32 %v3068_v60, %v1579_v63  ;;  %v1551_v15 = vpop.f32.mrb[9].mxu0 }
 0x75b   :  { %v4125_v16 = vadd.f32 %v1579_v63, %v1551_v15  ;;  %v1742_v15 = vld [vmem:[#allocation2 + $0x768] sm:$0xff] }
 0x75c   :  { %v1590_v17 = vmul.f32 %v2269_v12, %v4120_v5  ;;  %v1741_v12 = vld [vmem:[#allocation2 + $0x760] sm:$0xff] }
 0x75d   :  { %v1589_v10 = vmul.f32 %v2268_v34, %v4125_v16  ;;  %v3071_v19 = vpop.f32.mrb[10].mxu0  ;;  %v3636_v34 = vpack.c.bf16 %v1742_v15, %v1741_v12  ;;  %v1932_v12 = vld [vmem:[%s4283_s5 + $0x60] sm:$0xff]  ;;  %v1933_v15 = vld [vmem:[%s4283_s5 + $0x68] sm:$0xff] }
 0x75e   :  { %v4132_v18 = vadd.f32 %v3071_v19, %v1579_v63  ;;  %v1561_v24 = vpop.f32.mrb[11].mxu0  ;;  %v1605_v25 = vmul.f32 %v1590_v17, %v4120_v5 }
 0x75f   :  { %v1604_v26 = vmul.f32 %v1589_v10, %v4125_v16  ;;  %v4139_v28 = vadd.f32 %v1579_v63, %v1561_v24  ;;  %v1593_v30 = vadd.f32 %v1590_v17, %v1589_v10  ;;  %v1740_v63 = vld [vmem:[#allocation2 + $0x758] sm:$0xff]  ;;  %v1743_v17 = vld [vmem:[#allocation2 + $0x770] sm:$0xff] }
 0x760   :  { %v1592_v29 = vmul.f32 %v2271_v13, %v4132_v18  ;;  %v3633_v60 = vpack.c.bf16 %v1740_v63, %v1739_v9  ;;  %v1744_v10 = vld [vmem:[#allocation2 + $0x778] sm:$0xff]  ;;  %v1930_v9 = vld [vmem:[%s4283_s5 + $0x50] sm:$0xff] }
 0x761   :  { %v1591_v31 = vmul.f32 %v2270_v11, %v4139_v28  ;;  %v1608_v33 = vadd.f32 %v1605_v25, %v1604_v26  ;;  %v3639_v19 = vpack.c.bf16 %v1744_v10, %v1743_v17  ;;  %v1931_v63 = vld [vmem:[%s4283_s5 + $0x58] sm:$0xff]  ;;  %v1934_v17 = vld [vmem:[%s4283_s5 + $0x70] sm:$0xff] }
 0x762   :  { %v1607_v32 = vmul.f32 %v1592_v29, %v4132_v18  ;;  %v1596_v37 = vsel %vm1595_vm5, %v1592_v29, 0.0  ;;  %v1935_v10 = vld [vmem:[%s4283_s5 + $0x78] sm:$0xff] }
 0x763   :  { %v1594_v35 = vadd.f32 %v1593_v30, %v1591_v31  ;;  %v1606_v36 = vmul.f32 %v1591_v31, %v4139_v28 }
 0x764   :  { %v1610_v41 = vsel %vm1595_vm5, %v1607_v32, 0.0 }
 0x765   :  { %v1597_v39 = vadd.f32 %v1596_v37, %v1594_v35  ;;  %v1609_v56 = vadd.f32 %v1608_v33, %v1606_v36 }
 0x767   :  { %v1598_v20 = vrot.slane %v1597_v39, 4  ;;  %v1611_v22 = vadd.f32 %v1610_v41, %v1609_v56 }
 0x769   :  { %v1599_v42 = vadd.f32 %v1598_v20, %v1597_v39  ;;  %v1612_v23 = vrot.slane %v1611_v22, 4 }
 0x76b   :  { %v1600_v27 = vrot.slane %v1599_v42, 2  ;;  %v1613_v43 = vadd.f32 %v1612_v23, %v1611_v22 }
 0x76d   :  { %v1614_v44 = vrot.slane %v1613_v43, 2  ;;  %v1601_v46 = vadd.f32 %v1600_v27, %v1599_v42 }
 0x76f   :  { %v1602_v49 = vrot.slane %v1601_v46, 1  ;;  %v1615_v40 = vadd.f32 %v1614_v44, %v1613_v43 }
 0x771   :  { %v1616_v38 = vrot.slane %v1615_v40, 1  ;;  %v1603_v45 = vadd.f32 %v1602_v49, %v1601_v46 }
 0x773   :  { %v1617_v21 = vadd.f32 %v1616_v38, %v1615_v40 }
 0x775   :  { %v1618_v50 = vsel %vm423_vm3, %v1603_v45, %v1617_v21 }
 0x776   :  { %3105 = vmatmul.mubr.f32.vlgmr.msra.gmra.mrb[8].mxu1 %v1618_v50 }
 0x777   :  { %3139 = vmatprep.mubr.msk.f32.mxu1 %vm3771_vm2, %v3772_v48  ;;  %3619 = vmatpush3.bf16.msra.mxu1 %v3618_v58 }
 0x778   :  { %3620 = vmatprep.subr.bf16.mxu1 %v3770_v0 }
 0x77b   :  { %3622 = vmatpush3.bf16.msra.mxu1 %v3621_v57  ;;  %v3652_v57 = vpack.c.bf16 %v1923_v47, %v1922_v59 }
 0x77c   :  { %3623 = vmatprep.subr.bf16.mxu1 %v3770_v0 }
 0x77f   :  { %3625 = vmatpush3.bf16.msra.mxu1 %v3624_v1  ;;  %v3655_v1 = vpack.c.bf16 %v1925_v62, %v1924_v61 }
 0x780   :  { %3626 = vmatprep.subr.bf16.mxu1 %v3770_v0 }
 0x783   :  { %3628 = vmatpush3.bf16.msra.mxu1 %v3627_v4  ;;  %v3658_v4 = vpack.c.bf16 %v1927_v3, %v1926_v2 }
 0x784   :  { %3629 = vmatprep.subr.bf16.mxu1 %v3770_v0 }
 0x787   :  { %3631 = vmatpush3.bf16.msra.mxu1 %v3630_v8  ;;  %v3661_v8 = vpack.c.bf16 %v1929_v7, %v1928_v6 }
 0x788   :  { %3632 = vmatprep.subr.bf16.mxu1 %v3770_v0 }
 0x78b   :  { %3634 = vmatpush3.bf16.msra.mxu1 %v3633_v60  ;;  %v3664_v60 = vpack.c.bf16 %v1931_v63, %v1930_v9 }
 0x78c   :  { %3635 = vmatprep.subr.bf16.mxu1 %v3770_v0 }
 0x78f   :  { %3637 = vmatpush3.bf16.msra.mxu1 %v3636_v34  ;;  %v3667_v34 = vpack.c.bf16 %v1933_v15, %v1932_v12 }
 0x790   :  { %3638 = vmatprep.subr.bf16.mxu1 %v3770_v0 }
 0x793   :  { %3640 = vmatpush3.bf16.msra.mxu1 %v3639_v19  ;;  %v3670_v19 = vpack.c.bf16 %v1935_v10, %v1934_v17 }
 0x794   :  { %3641 = vmatprep.subr.bf16.mxu1 %v3770_v0 }
 0x849   :  { %v1702_v13 = vpop.f32.mrb[8].mxu1 }
 0x84a   :  { %v1706_v24 = vmul.f32 0.005, %v1702_v13  ;;  %v3106_v11 = vpop.f32.mrb[9].mxu1  ;;  %v1913_v13 = vld [vmem:[%s4284_s6] sm:$0xff] }
 0x84c   :  { %v1707_v25 = vmul.f32 %v1706_v24, %v1706_v24 }
 0x84e   :  { %v1709_v26 = vrot.slane %v1707_v25, 7 }
 0x850   :  { %v1711_v29 = vsub.f32 %v1706_v24, %v1709_v26 }
 0x852   :  { %v1712_v30 = vmax.f32 %v1711_v29, 0.0  ;;  %v1919_v29 = vld [vmem:[%s4284_s6 + $0x30] sm:$0xff] }
 0x854   :  { %v1713_v31 = vadd.f32 1e-05, %v1712_v30  ;;  %v1939_v30 = vrot.slane %v1919_v29, %v3893_v55 }
 0x856   :  { %3717 = vrsqrt.f32 %v1713_v31 }
 0x860   :  { %v3718_v32 = vpop.eup %3717 }
 0x861   :  { %v1715_v33 = vmul.f32 %v3718_v32, %v4113_v14 }
 0x863   :  { %v1717_v35 = vrot.slane %v1715_v33, 1 }
 0x865   :  { %v1719_v36 = vmul.f32 %v1717_v35, %v1706_v24  ;;  %v1914_v24 = vld [vmem:[%s4284_s6 + $0x8] sm:$0xff] }
 0x866   :  { %v3673_v11 = vpack.c.bf16 %v1914_v24, %v1913_v13 }
 0x867   :  { %v1721_v37 = vrot.slane %v1719_v36, 6  ;;  %v1916_v36 = vld [vmem:[%s4284_s6 + $0x18] sm:$0xff] }
 0x868   :  { %3674 = vmatpush3.bf16.msra.mxu0 %v3673_v11 }
 0x869   :  { %v1723_v39 = vsub.f32 %v4113_v14, %v1721_v37  ;;  %3675 = vmatprep.subr.bf16.mxu0 %v3770_v0 }
 0x86b   :  { %v1725_v56 = vrot.slane %v1723_v39, 1 }
 0x86d   :  { %v1727_v41 = vsel %vm423_vm3, %v1717_v35, %v1725_v56 }
 0x86e   :  { %3140 = vmatmul.mubr.f32.vlgmr.msra.gmra.mrb[10].mxu1 %v1727_v41 }
 0x86f   :  { %3150 = vmatprep.mubr.msk.f32.mxu1 %vm3771_vm2, %v3772_v48 }
 0x941   :  { %v1811_v20 = vpop.f32.mrb[10].mxu1 }
 0x942   :  { %v1818_v22 = vrot.slane %v1811_v20, %v3893_v55  ;;  %v3141_v42 = vpop.f32.mrb[11].mxu1  ;;  %v1826_v23 = vrot.slane %v1811_v20, %v3947_v51  ;;  %v2014_v55 = vrot.slane %v1919_v29, %v3947_v51 }
 0x944   :  { %v1819_v27 = vmul.f32 %v1818_v22, %v4125_v16  ;;  %v1820_v43 = vmul.f32 %v1818_v22, %v4120_v5  ;;  %v1821_v44 = vmul.f32 %v1818_v22, %v4139_v28  ;;  %v1822_v14 = vmul.f32 %v1818_v22, %v4132_v18  ;;  %v1920_v5 = vld [vmem:[%s4283_s5] sm:$0xff]  ;;  %v1921_v16 = vld [vmem:[%s4283_s5 + $0x8] sm:$0xff] }
 0x945   :  { %v1835_v28 = vld [vmem:[%s4282_s4] sm:$0x3]  ;;  %v3649_v58 = vpack.c.bf16 %v1921_v16, %v1920_v5  ;;  %v1918_v22 = vld [vmem:[%s4284_s6 + $0x28] sm:$0xff] }
 0x946   :  { %v1827_v46 = vadd.f32 %v1826_v23, %v1819_v27  ;;  %v1828_v49 = vadd.f32 %v1826_v23, %v1820_v43  ;;  %v1829_v40 = vadd.f32 %v1826_v23, %v1821_v44  ;;  %v1830_v38 = vadd.f32 %v1826_v23, %v1822_v14 }
 0x947   :  { %v2092_v23 = vsub.s32 2, %v3890_v54 }
 0x948   :  { %v1831_v45 = vmax.f32 %v1827_v46, 0.0  ;;  %v1832_v21 = vmax.f32 %v1828_v49, 0.0  ;;  %v1833_v50 = vmax.f32 %v1829_v40, 0.0  ;;  %v1834_v52 = vmax.f32 %v1830_v38, 0.0 }
 0x949   :  { %v2093_v27 = vrot.slane %v1919_v29, %v2092_v23  ;;  %v2170_v46 = vsub.s32 3, %v3890_v54 }
 0x94a   :  { %v3642_v53 = vpack.c.bf16 %v1832_v21, %v1831_v45  ;;  %v3645_v18 = vpack.c.bf16 %v1834_v52, %v1833_v50 }
 0x94b   :  { %v2171_v49 = vrot.slane %v1919_v29, %v2170_v46 }
 0x94c   :  { %3643 = vmatpush3.bf16.msra.mxu1 %v3642_v53 }
 0x94d   :  { %3644 = vmatprep.subr.bf16.mxu1 %v3770_v0 }
 0x950   :  { %3647 = vmatpush3.bf16.msk.msra.mxu1 %vm3646_vm7, %v3645_v18 }
 0x951   :  { %3648 = vmatprep.subr.bf16.mxu1 %v3770_v0 }
 0x953   :  { %3151 = vmatmul.mubr.msk.f32.vlgmr.msra.gmra.mrb[12].mxu1 %vm1836_vm8, %v1835_v28 }
 0x954   :  { %3650 = vmatpush3.bf16.msra.mxu1 %v3649_v58  ;;  %3185 = vmatprep.mubr.msk.f32.mxu1 %vm3771_vm2, %v3772_v48 }
 0x955   :  { %3651 = vmatprep.subr.bf16.mxu1 %v3770_v0 }
 0x958   :  { %3653 = vmatpush3.bf16.msra.mxu1 %v3652_v57 }
 0x959   :  { %3654 = vmatprep.subr.bf16.mxu1 %v3770_v0 }
 0x95c   :  { %3656 = vmatpush3.bf16.msra.mxu1 %v3655_v1 }
 0x95d   :  { %3657 = vmatprep.subr.bf16.mxu1 %v3770_v0 }
 0x960   :  { %3659 = vmatpush3.bf16.msra.mxu1 %v3658_v4 }
 0x961   :  { %3660 = vmatprep.subr.bf16.mxu1 %v3770_v0 }
 0x964   :  { %3662 = vmatpush3.bf16.msra.mxu1 %v3661_v8 }
 0x965   :  { %3663 = vmatprep.subr.bf16.mxu1 %v3770_v0 }
 0x968   :  { %3665 = vmatpush3.bf16.msra.mxu1 %v3664_v60 }
 0x969   :  { %3666 = vmatprep.subr.bf16.mxu1 %v3770_v0 }
 0x96c   :  { %3668 = vmatpush3.bf16.msra.mxu1 %v3667_v34 }
 0x96d   :  { %3669 = vmatprep.subr.bf16.mxu1 %v3770_v0 }
 0x970   :  { %3671 = vmatpush3.bf16.msra.mxu1 %v3670_v19 }
 0x971   :  { %3678 = vmatprep.subr.bf16.mxu1 %v3770_v0  ;;  %v1915_v0 = vld [vmem:[%s4284_s6 + $0x10] sm:$0xff] }
 0x972   :  { %v3676_v37 = vpack.c.bf16 %v1916_v36, %v1915_v0 }
 0xa26   :  { %v1909_v25 = vpop.f32.mrb[12].mxu1 }
 0xa27   :  { %v3152_v26 = vpop.f32.mrb[13].mxu1  ;;  %3186 = vmatmul.mubr.f32.vlgmr.msra.gmra.mrb[14].mxu1 %v1909_v25 }
 0xa28   :  { %3206 = vmatprep.mubr.msk.f32.mxu1 %vm3771_vm2, %v3772_v48 }
 0xafa   :  { %v2006_v31 = vpop.f32.mrb[14].mxu1 }
 0xafb   :  { %v2007_v32 = vadd.f32 %v2006_v31, %v1939_v30  ;;  %v3187_v33 = vpop.f32.mrb[15].mxu1 }
 0xafd   :  { %v2010_v35 = vmax.f32 %v2007_v32, 0.0 }
 0xaff   :  { %3193 = vmatmul.mubr.msk.f32.vlgmr.msra.gmra.mrb[12].mxu0 %vm2015_vm9, %v2010_v35 }
 0xb00   :  { %3199 = vmatprep.mubr.msk.f32.mxu0 %vm3771_vm2, %v3772_v48  ;;  %3677 = vmatpush3.bf16.msra.mxu0 %v3676_v37  ;;  %v1917_v48 = vld [vmem:[%s4284_s6 + $0x20] sm:$0xff]  ;;  %s3741_s6 = scalar_lea.vmem %s2254_s19, 32 }
 0xb01   :  { %v3679_v42 = vpack.c.bf16 %v1918_v22, %v1917_v48  ;;  %p3742_p8 = scmp.ne.s32.totalorder %s2254_s19, %s3741_s6  ;;  %p3747_p10 = scmp.lt.s32.totalorder %s3741_s6, %s3741_s6 }
 0xb03   :  { %3680 = vmatpush3.bf16.msra.mxu1 %v3679_v42  ;;  %p3748_p11 = por %p3747_p10, %p3746_p9 }
 0xb05   :  { %p3749_p12 = pnand %p3748_p11, %p3742_p8 }
 0xbd2   :  { %v2085_v39 = vpop.f32.mrb[12].mxu0 }
 0xbd3   :  { %v2086_v56 = vadd.f32 %v2085_v39, %v2014_v55  ;;  %v3194_v41 = vpop.f32.mrb[13].mxu0 }
 0xbd5   :  { %v2089_v20 = vmax.f32 %v2086_v56, 0.0 }
 0xbd7   :  { %3200 = vmatmul.mubr.msk.f32.vlgmr.msra.gmra.mrb[14].mxu0 %vm2015_vm9, %v2089_v20 }
 0xcaa   :  { %v2163_v51 = vpop.f32.mrb[14].mxu0 }
 0xcab   :  { %v2164_v43 = vadd.f32 %v2163_v51, %v2093_v27  ;;  %v3201_v44 = vpop.f32.mrb[15].mxu0 }
 0xcad   :  { %v2167_v14 = vmax.f32 %v2164_v43, 0.0 }
 0xcaf   :  { %3207 = vmatmul.mubr.msk.f32.vlgmr.msra.gmra.mrb[16].mxu1 %vm2015_vm9, %v2167_v14 }
 0xd82   :  { %v2241_v40 = vpop.f32.mrb[16].mxu1 }
 0xd83   :  { %v2242_v38 = vadd.f32 %v2241_v40, %v2171_v49  ;;  %v3208_v45 = vpop.f32.mrb[17].mxu1 }
 0xd85   :  { %2246 = vst.msk [vmem:[#allocation5] sm:$0x3] %vm2245_vm10, %v2242_v38 }
 0xd86   :  { %3752 = shalt.err (!%p3749_p12)
}
 0xd87   :  { %s3753_s0 = scalar_lea.hbm %s4285_s7, 32 }
 0xd88   :  { %p3754_p13 = scmp.ne.s32.totalorder %s4285_s7, %s3753_s0  ;;  %p3757_p0 = scmp.lt.u32.totalorder %s3753_s0, %s4285_s7 }
 0xd8a   :  { %p3759_p1 = pnand %p3757_p0, %p3754_p13 }
 0xd8c   :  { %3762 = shalt.err (!%p3759_p1)
}
 0xd8d   :  { %2256 = dma.vmem_to_hbm [thread:$0]  %s2254_s19, 32, %s4285_s7, [#allocation4]  }
 0xd8e   :  { %3765 = dma.done.wait [#allocation4], 32  }
 0xd8f   :  { %3766 = vsyncadd [#allocation4], 4294967264 }
 0xd90   :  { %2260 = vsyncpa [#allocation3], 1 }
 0xd91   :  { %2261 = vsyncpa [#allocation4], 1 }

</bundles_post_ra>
